<compile_context>
chip_gen: v6e
topology: v6e:2x2x1
jax: 0.10.0
libtpu: 0.0.40
codegen_flags: <defaults>
</compile_context>

<pallas_src>
import math

import jax
import jax.numpy as jnp
from jax import lax
from jax.experimental import pallas as pl
from jax.experimental.pallas import tpu as pltpu


def _round_up(x, m):
    return ((x + m - 1) // m) * m


def _pick_tile(dim, cap, align, min_div_tile):
    """Largest tile <= cap (multiple of `align`), preferring one that divides
    round_up(dim, align) exactly so no tile-sized padding of weights is needed."""
    dim_a = _round_up(dim, align)
    t_max = max(align, (min(cap, dim_a) // align) * align)
    t = t_max
    while t >= max(align, min_div_tile):
        if dim_a % t == 0:
            return t
        t -= align
    return t_max  # no good divisor; caller pads dim up to a multiple of t_max


def _vmem_limit_bytes():
    """Generation-aware scoped-VMEM limit: ~half of physical, capped at 64 MiB
    (=> ~32 MiB on v7x's 64 MiB VMEM, 64 MiB on v5e/v6e's 128 MiB)."""
    try:
        cap = int(pltpu.get_tpu_info().vmem_capacity_bytes)
    except Exception:  # pragma: no cover - conservative fallback
        cap = 64 * 1024 * 1024
    return int(min(64 * 2**20, max(32 * 2**20, cap // 2)))


def noisy_linear_kernel(x_ref, w_ref, nw_ref, in_noise_ref, out_noise_ref,
                        b_eff_ref, o_ref, acc_ref):
    k = pl.program_id(2)

    @pl.when(k == 0)
    def _():
        acc_ref[...] = jnp.zeros_like(acc_ref)

    x = x_ref[...]                                   # (tm, tk)
    dn = (((1,), (1,)), ((), ()))                    # contract last dims (no .T)

    # Deterministic path: x @ W.T
    det = lax.dot_general(x, w_ref[...], dimension_numbers=dn,
                          preferred_element_type=jnp.float32)

    # Noisy path (rank-1 factorization): ((x * in_noise) @ NW.T) * out_noise
    xn = x * in_noise_ref[...]                       # (tm, tk) * (1, tk)
    noisy = lax.dot_general(xn, nw_ref[...], dimension_numbers=dn,
                            preferred_element_type=jnp.float32)

    # Single merged accumulator (out_noise tile is already resident).
    acc_ref[...] += det + noisy * out_noise_ref[...]

    @pl.when(k == pl.num_programs(2) - 1)
    def _():
        o_ref[...] = (acc_ref[...] + b_eff_ref[...]).astype(o_ref.dtype)


def noisy_linear_forward(x, weight, noisy_weight, bias, noisy_bias,
                         in_noise, out_noise):
    """x: (B, In); weight/noisy_weight: (Out, In);
    bias/noisy_bias/out_noise: (Out,); in_noise: (In,)."""
    B, In = x.shape
    Out = weight.shape[0]
    out_dtype = x.dtype

    # Sublane alignment per dtype packing (f32: 8, bf16: 16, int8/fp8: 32).
    sub = max(8, 32 // jnp.dtype(x.dtype).itemsize)

    # Large tiles (HBM-bound kernel, ~0.35us/grid-step overhead): tk<=2048,
    # tn<=512, tm<=256. Double-buffered f32 W+NW tiles at (256,512,2048) are
    # ~16 MiB + ~6 MiB act/acc, safely under the 32 MiB v7x budget below.
    tm = min(256, _round_up(B, sub))
    tk = _pick_tile(In, 2048, 128, 512)
    tn = _pick_tile(Out, 512, 128, 256)

    Bp = _round_up(B, tm)
    Inp = _round_up(In, tk)
    Outp = _round_up(Out, tn)

    # Megacore / v7x: if the batch fills a single M block, split N into >= 2
    # blocks so both TensorCores get a "parallel" block to work on.
    if Bp // tm == 1 and Outp // tn < 2 and Outp >= 2 * 128:
        tn_half = ((Outp // 2) // 128) * 128
        if tn_half >= 128 and Outp % tn_half == 0:
            tn = tn_half

    def _pad2(a, rows, cols):
        pr, pc = rows - a.shape[0], cols - a.shape[1]
        if pr == 0 and pc == 0:
            return a                                 # hot path: no HBM copy
        # TODO(synk): for ragged In/Out in a training loop, pad the parameters
        # once at init (or mask the K tail in-kernel) instead of per-call pad.
        return jnp.pad(a, ((0, pr), (0, pc)))

    xp = _pad2(x, Bp, Inp)
    wp = _pad2(weight, Outp, Inp)
    nwp = _pad2(noisy_weight, Outp, Inp)
    in2 = _pad2(in_noise.reshape(1, In), 1, Inp)
    on2 = _pad2(out_noise.reshape(1, Out), 1, Outp)
    # Fold both biases into one effective bias vector (Out-sized, trivial).
    b_eff = bias + noisy_bias * out_noise
    be2 = _pad2(b_eff.reshape(1, Out), 1, Outp)

    grid = (Bp // tm, Outp // tn, Inp // tk)

    out = pl.pallas_call(
        noisy_linear_kernel,
        out_shape=jax.ShapeDtypeStruct((Bp, Outp), out_dtype),
        grid_spec=pltpu.PrefetchScalarGridSpec(
            num_scalar_prefetch=0,
            grid=grid,
            in_specs=[
                pl.BlockSpec((tm, tk), lambda i, j, k: (i, k)),   # x
                pl.BlockSpec((tn, tk), lambda i, j, k: (j, k)),   # weight
                pl.BlockSpec((tn, tk), lambda i, j, k: (j, k)),   # noisy_weight
                pl.BlockSpec((1, tk), lambda i, j, k: (0, k)),    # in_noise
                pl.BlockSpec((1, tn), lambda i, j, k: (0, j)),    # out_noise
                pl.BlockSpec((1, tn), lambda i, j, k: (0, j)),    # b_eff
            ],
            out_specs=pl.BlockSpec((tm, tn), lambda i, j, k: (i, j)),
            scratch_shapes=[
                pltpu.VMEM((tm, tn), jnp.float32),   # merged f32 accumulator
            ],
        ),
        compiler_params=pltpu.CompilerParams(
            dimension_semantics=("parallel", "parallel", "arbitrary"),
            vmem_limit_bytes=_vmem_limit_bytes(),
        ),
    )(xp, wp, nwp, in2, on2, be2)

    if (Bp, Outp) != (B, Out):
        out = out[:B, :Out]
    return out


def reference_forward(x, weight, noisy_weight, bias, noisy_bias,
                      in_noise, out_noise):
    noise = jnp.outer(out_noise, in_noise)           # as PyTorch sample_noise
    hp = lax.Precision.HIGHEST
    normal_y = jnp.dot(x, weight.T, precision=hp) + bias
    noisy_y = (jnp.dot(x, (noisy_weight * noise).T, precision=hp)
               + noisy_bias * out_noise)
    return noisy_y + normal_y


if __name__ == "__main__":
    # Small linear-layer shapes; In > tk cap/2 so the K-reduction accumulator
    # path is exercised (grid = (1, 2, 2) here) while Out=256 also exercises
    # the >=2-parallel-block split for megacore.
    batch, in_features, out_features = 8, 4096, 256
    sigma0 = 0.5
    noise_std = sigma0 / math.sqrt(in_features)
    stdv = 1.0 / math.sqrt(in_features)

    key = jax.random.PRNGKey(0)
    kx, kw, kb, knw, knb, kin, kout = jax.random.split(key, 7)

    x = jax.random.normal(kx, (batch, in_features), dtype=jnp.float32)

    # Deterministic parameter init mirroring reset_parameters (uniform(-stdv, stdv)).
    weight = jax.random.uniform(kw, (out_features, in_features),
                                minval=-stdv, maxval=stdv, dtype=jnp.float32)
    bias = jax.random.uniform(kb, (out_features,),
                              minval=-stdv, maxval=stdv, dtype=jnp.float32)
    noisy_weight = jax.random.uniform(knw, (out_features, in_features),
                                      minval=-stdv, maxval=stdv,
                                      dtype=jnp.float32)
    noisy_bias = jax.random.uniform(knb, (out_features,),
                                    minval=-stdv, maxval=stdv,
                                    dtype=jnp.float32)

    # Deterministic equivalent of sample_noise(): only the two factor vectors
    # are needed (the rank-1 outer product is folded into the kernel).
    in_noise = noise_std * jax.random.normal(kin, (in_features,), jnp.float32)
    out_noise = noise_std * jax.random.normal(kout, (out_features,), jnp.float32)

    out = noisy_linear_forward(x, weight, noisy_weight, bias, noisy_bias,
                               in_noise, out_noise)
    out = jax.block_until_ready(out)

    ref = reference_forward(x, weight, noisy_weight, bias, noisy_bias,
                            in_noise, out_noise)
    assert out.shape == (batch, out_features)
    assert jnp.allclose(out, ref, atol=3e-4, rtol=3e-4), "mismatch vs reference"

    print("KERNEL_OK")
</pallas_src>

<mosaic_0001>
module attributes {stable_mosaic.version = 11 : i64} {
  func.func @noisy_linear_kernel(%arg0: i32, %arg1: i32, %arg2: i32, %arg3: memref<8x2048xf32, #tpu.memory_space<vmem>>, %arg4: memref<128x2048xf32, #tpu.memory_space<vmem>>, %arg5: memref<128x2048xf32, #tpu.memory_space<vmem>>, %arg6: memref<1x2048xf32, #tpu.memory_space<vmem>>, %arg7: memref<1x128xf32, #tpu.memory_space<vmem>>, %arg8: memref<1x128xf32, #tpu.memory_space<vmem>>, %arg9: memref<8x128xf32, #tpu.memory_space<vmem>>, %arg10: memref<8x128xf32, #tpu.memory_space<vmem>>) attributes {dimension_semantics = [#tpu.dimension_semantics<parallel>, #tpu.dimension_semantics<parallel>, #tpu.dimension_semantics<arbitrary>], iteration_bounds = array<i64: 1, 2, 2>, scalar_prefetch = 0 : i64, scratch_operands = 1 : i64, tpu.core_type = #tpu.core_type<tc>, window_params = [{transform_indices = @transform_0, window_bounds = array<i64: 8, 2048>}, {transform_indices = @transform_1, window_bounds = array<i64: 128, 2048>}, {transform_indices = @transform_2, window_bounds = array<i64: 128, 2048>}, {transform_indices = @transform_3, window_bounds = array<i64: 1, 2048>}, {transform_indices = @transform_4, window_bounds = array<i64: 1, 128>}, {transform_indices = @transform_5, window_bounds = array<i64: 1, 128>}, {transform_indices = @transform_6, window_bounds = array<i64: 8, 128>}]} {
    %c0_i32 = arith.constant 0 : i32
    %0 = arith.cmpi eq, %arg2, %c0_i32 : i32
    %1 = arith.extui %0 : i1 to i32
    %c0_i32_0 = arith.constant 0 : i32
    %2 = arith.cmpi ne, %1, %c0_i32_0 : i32
    scf.if %2 {
      %cst_16 = arith.constant 0.000000e+00 : f32
      %21 = vector.broadcast %cst_16 : f32 to vector<8x128xf32>
      %c0_17 = arith.constant 0 : index
      %c0_18 = arith.constant 0 : index
      %22 = vector.load %arg10[%c0_17, %c0_18] : memref<8x128xf32, #tpu.memory_space<vmem>>, vector<8x128xf32>
      tpu.vector_store %arg10[%c0_17, %c0_18], %21 {strides = array<i32>} : memref<8x128xf32, #tpu.memory_space<vmem>>, vector<8x128xf32>,
    } else {
    }
    %c0 = arith.constant 0 : index
    %c0_1 = arith.constant 0 : index
    %3 = vector.load %arg3[%c0, %c0_1] : memref<8x2048xf32, #tpu.memory_space<vmem>>, vector<8x2048xf32>
    %c0_2 = arith.constant 0 : index
    %c0_3 = arith.constant 0 : index
    %4 = vector.load %arg4[%c0_2, %c0_3] : memref<128x2048xf32, #tpu.memory_space<vmem>>, vector<128x2048xf32>
    %cst = arith.constant dense<0.000000e+00> : vector<8x128xf32>
    %5 = tpu.matmul %3, %4, %cst {dimension_numbers = #tpu.dot_dimension_numbers<[1], [1], [0], [0], [0, 0, 1, 0], [], []>} : vector<8x2048xf32>, vector<128x2048xf32>, vector<8x128xf32> -> vector<8x128xf32>
    %c0_4 = arith.constant 0 : index
    %c0_5 = arith.constant 0 : index
    %6 = vector.load %arg6[%c0_4, %c0_5] : memref<1x2048xf32, #tpu.memory_space<vmem>>, vector<1x2048xf32>
    %7 = vector.broadcast %6 : vector<1x2048xf32> to vector<8x2048xf32>
    %8 = arith.mulf %3, %7 : vector<8x2048xf32>
    %c0_6 = arith.constant 0 : index
    %c0_7 = arith.constant 0 : index
    %9 = vector.load %arg5[%c0_6, %c0_7] : memref<128x2048xf32, #tpu.memory_space<vmem>>, vector<128x2048xf32>
    %cst_8 = arith.constant dense<0.000000e+00> : vector<8x128xf32>
    %10 = tpu.matmul %8, %9, %cst_8 {dimension_numbers = #tpu.dot_dimension_numbers<[1], [1], [0], [0], [0, 0, 1, 0], [], []>} : vector<8x2048xf32>, vector<128x2048xf32>, vector<8x128xf32> -> vector<8x128xf32>
    %c0_9 = arith.constant 0 : index
    %c0_10 = arith.constant 0 : index
    %11 = vector.load %arg10[%c0_9, %c0_10] : memref<8x128xf32, #tpu.memory_space<vmem>>, vector<8x128xf32>
    %c0_11 = arith.constant 0 : index
    %c0_12 = arith.constant 0 : index
    %12 = vector.load %arg7[%c0_11, %c0_12] : memref<1x128xf32, #tpu.memory_space<vmem>>, vector<1x128xf32>
    %13 = vector.broadcast %12 : vector<1x128xf32> to vector<8x128xf32>
    %14 = arith.mulf %10, %13 : vector<8x128xf32>
    %15 = arith.addf %5, %14 : vector<8x128xf32>
    %16 = arith.addf %11, %15 : vector<8x128xf32>
    %c0_13 = arith.constant 0 : index
    %c0_14 = arith.constant 0 : index
    %17 = vector.load %arg10[%c0_13, %c0_14] : memref<8x128xf32, #tpu.memory_space<vmem>>, vector<8x128xf32>
    tpu.vector_store %arg10[%c0_13, %c0_14], %16 {strides = array<i32>} : memref<8x128xf32, #tpu.memory_space<vmem>>, vector<8x128xf32>,
    %c1_i32 = arith.constant 1 : i32
    %18 = arith.cmpi eq, %arg2, %c1_i32 : i32
    %19 = arith.extui %18 : i1 to i32
    %c0_i32_15 = arith.constant 0 : i32
    %20 = arith.cmpi ne, %19, %c0_i32_15 : i32
    scf.if %20 {
      %c0_16 = arith.constant 0 : index
      %c0_17 = arith.constant 0 : index
      %21 = vector.load %arg10[%c0_16, %c0_17] : memref<8x128xf32, #tpu.memory_space<vmem>>, vector<8x128xf32>
      %c0_18 = arith.constant 0 : index
      %c0_19 = arith.constant 0 : index
      %22 = vector.load %arg8[%c0_18, %c0_19] : memref<1x128xf32, #tpu.memory_space<vmem>>, vector<1x128xf32>
      %23 = vector.broadcast %22 : vector<1x128xf32> to vector<8x128xf32>
      %24 = arith.addf %21, %23 : vector<8x128xf32>
      %c0_20 = arith.constant 0 : index
      %c0_21 = arith.constant 0 : index
      %25 = vector.load %arg9[%c0_20, %c0_21] : memref<8x128xf32, #tpu.memory_space<vmem>>, vector<8x128xf32>
      tpu.vector_store %arg9[%c0_20, %c0_21], %24 {strides = array<i32>} : memref<8x128xf32, #tpu.memory_space<vmem>>, vector<8x128xf32>,
    } else {
    }
    return
  }
  func.func @transform_0(%arg0: i32, %arg1: i32, %arg2: i32) -> (i32, i32) {
    %c0_i32 = arith.constant 0 : i32
    return %arg0, %arg2 : i32, i32
  }
  func.func @transform_1(%arg0: i32, %arg1: i32, %arg2: i32) -> (i32, i32) {
    %c0_i32 = arith.constant 0 : i32
    return %arg1, %arg2 : i32, i32
  }
  func.func @transform_2(%arg0: i32, %arg1: i32, %arg2: i32) -> (i32, i32) {
    %c0_i32 = arith.constant 0 : i32
    return %arg1, %arg2 : i32, i32
  }
  func.func @transform_3(%arg0: i32, %arg1: i32, %arg2: i32) -> (i32, i32) {
    %c0_i32 = arith.constant 0 : i32
    %c0_i32_0 = arith.constant 0 : i32
    return %c0_i32, %arg2 : i32, i32
  }
  func.func @transform_4(%arg0: i32, %arg1: i32, %arg2: i32) -> (i32, i32) {
    %c0_i32 = arith.constant 0 : i32
    %c0_i32_0 = arith.constant 0 : i32
    return %c0_i32, %arg1 : i32, i32
  }
  func.func @transform_5(%arg0: i32, %arg1: i32, %arg2: i32) -> (i32, i32) {
    %c0_i32 = arith.constant 0 : i32
    %c0_i32_0 = arith.constant 0 : i32
    return %c0_i32, %arg1 : i32, i32
  }
  func.func @transform_6(%arg0: i32, %arg1: i32, %arg2: i32) -> (i32, i32) {
    %c0_i32 = arith.constant 0 : i32
    return %arg0, %arg1 : i32, i32
  }
}

</mosaic_0001>

<bundles_post_ra>
// kernel: tpu_custom_call.1
= control target key start
LH: loop header
LB: loop body
LE: loop exit
PB: predicated region body
PF: predicated region fallthrough
CT: control target
= control target key end

     0   :  { %s4091_s0 = inlined_call_operand.hbm [shape: f32[8,4096], index: 0, kind: input, shape index: {}]   ;;  %s4092_s1 = inlined_call_operand.hbm [shape: f32[256,4096], index: 1, kind: input, shape index: {}]   ;;  %s4093_s2 = inlined_call_operand.hbm [shape: f32[256,4096], index: 2, kind: input, shape index: {}]   ;;  %s4094_s3 = inlined_call_operand.hbm [shape: f32[1,4096], index: 3, kind: input, shape index: {}]   ;;  %s4095_s4 = inlined_call_operand.hbm [shape: f32[1,256], index: 4, kind: input, shape index: {}]   ;;  %s4096_s5 = inlined_call_operand.hbm [shape: f32[1,256], index: 5, kind: input, shape index: {}]   ;;  %s4097_s6 = inlined_call_operand.hbm [shape: f32[8,256], index: 6, kind: output, shape index: {}]  }
   0x1   :  { %4117 = sst [smem:[#allocation33_spill]] %s4092_s1 }
   0x2   :  { %4118 = sst [smem:[#allocation34_spill]] %s4093_s2 }
   0x3   :  { %4119 = sst [smem:[#allocation35_spill]] %s4094_s3 }
   0x4   :  { %4120 = sst [smem:[#allocation36_spill]] %s4096_s5 }
   0x5   :  { %4121 = sst [smem:[#allocation37_spill]] %s4097_s6 }
   0x6   :  { %11 = vsyncpa [#allocation4], 0 }
   0x7   :  { %13 = vsyncpa [#allocation4 + $0x1], 0 }
   0x8   :  { %14 = vsyncpa [#allocation7], 0 }
   0x9   :  { %16 = vsyncpa [#allocation7 + $0x1], 0 }
   0xa   :  { %17 = vsyncpa [#allocation10], 0 }
   0xb   :  { %19 = vsyncpa [#allocation10 + $0x1], 0 }
   0xc   :  { %20 = vsyncpa [#allocation13], 0 }
   0xd   :  { %22 = vsyncpa [#allocation13 + $0x1], 0 }
   0xe   :  { %23 = vsyncpa [#allocation5], 0 }
   0xf   :  { %25 = vsyncpa [#allocation5 + $0x1], 0  ;;  %s3068_s21 = smov 0   ;;  %s3070_s22 = smov 0  }
  0x10   :  { %s3072_s23 = smov 0   ;;  %s3074_s24 = smov 0  }
  0x11   :  { %s3076_s25 = smov 0   ;;  %s3078_s26 = smov 0  }
  0x12   :  { %s3080_s27 = smov 0   ;;  %s3082_s28 = smov 0  }
  0x13   :  { %s3084_s29 = smov 0   ;;  %s3086_s30 = smov 0  }
  0x14   :  { %s3088_s7 = smov 0   ;;  %s3090_s8 = smov 0  }
  0x15   :  { %s3092_s9 = smov 0   ;;  %s3094_s10 = smov 0  }
  0x16 LB: > { %4122 = sst [smem:[#allocation21_spill]] %s2984_s25  ;;  %p4114_p0 = scmp.eq.s32.totalorder %s3020_s10, 0  ;;  %s3020_s10 = sphi %s3094_s10, %s31_s10   ;;  %s3016_s9 = sphi %s3092_s9, %s4185_s9   ;;  %s3012_s8 = sphi %s3090_s8, %s4184_s8   ;;  %s3008_s7 = sphi %s3088_s7, %s4183_s7   ;;  %s3004_s30 = sphi %s3086_s30, %s4182_s30   ;;  %s3000_s29 = sphi %s3084_s29, %s4172_s29   ;;  %s2996_s28 = sphi %s3082_s28, %s4171_s28   ;;  %s2992_s27 = sphi %s3080_s27, %s4181_s27   ;;  %s2988_s26 = sphi %s3078_s26, %s4169_s26   ;;  %s2984_s25 = sphi %s3076_s25, %s4180_s25   ;;  %s2980_s24 = sphi %s3074_s24, %s4179_s24   ;;  %s2976_s23 = sphi %s3072_s23, %s4178_s23   ;;  %s2972_s22 = sphi %s3070_s22, %s4177_s22   ;;  %s2968_s21 = sphi %s3068_s21, %s4176_s21  }
  0x17   : > { %4123 = sst [smem:[#allocation22_spill]] %s2988_s26  ;;  %p94_p1 = scmp.ne.s32.totalorder %s2988_s26, %s2984_s25 }
  0x18   : > { %4124 = sst [smem:[#allocation23_spill]] %s2996_s28  ;;  %p100_p2 = scmp.ne.s32.totalorder %s2984_s25, %s2980_s24 }
  0x19   : > { %4125 = sst [smem:[#allocation24_spill]] %s3000_s29  ;;  %p96_p3 = por %p94_p1, %p4114_p0 }
  0x1a   : > { %4126 = sst [smem:[#allocation25_spill]] %s3004_s30  ;;  %p4112_p4 = scmp.lt.s32.totalorder %s3020_s10, 4 }
  0x1b   : > { %4127 = sst [smem:[#allocation26_spill]] %s3008_s7  ;;  %s4099_s13 = sand.u32 1, %s3020_s10  }
  0x1c   : > { %s281_s14 = sand.u32 1, %s2988_s26   ;;  %s2490_s16 = sshll.u32 %s3012_s8, 4 }
  0x1d   : > { %s3150_s15 = sshll.u32 %s281_s14, 11  ;;  %s2518_s17 = sshll.u32 %s3016_s9, 9 }
  0x1e   : > { %s283_s18 = scalar_lea.vmem [#allocation6], %s3150_s15  ;;  %s290_s20 = sadd.s32 %s2518_s17, %s2490_s16 }
  0x1f   : > { %s293_s19 = sshll.u32 %s283_s18, 4  ;;  %s2492_s11 = sshll.u32 %s290_s20, 7  ;;  %s294_s19 = int_to_ptr.vmem [resolvable:$true] %s293_s19 }
  0x20   : > { %p3157_p5 = pnand %p4112_p4, %p96_p3  ;;  %s4129_s1 = sld [smem:[#allocation33_spill]] }
  0x21   : > { %s3166_s30 = scalar_lea.sflag [#allocation7], %s4099_s13  ;;  %s2705_s18 = scalar_lea.vmem %s294_s19, 32768 }
  0x22   : > { %p4116_p6 = pneg %p3157_p5  ;;  %p2706_p7 = scmp.ne.s32.totalorder %s294_s19, %s2705_s18 }
  0x23   : > { %s3022_s16 = smov [#allocation6]  }
  0x24   : > { %p2708_p8 = pnand %p2706_p7, %p4116_p6  ;;  %s2710_s17 = sshll.u32 %s3022_s16, 4  ;;  %s2711_s17 = int_to_ptr.vmem [resolvable:$false] %s2710_s17 }
  0x25   : > { %s2712_s20 = scalar_lea.vmem %s2711_s17, 65536  ;;  %p2713_p10 = scmp.lt.s32.totalorder %s294_s19, %s2711_s17 }
  0x26   : > { %s292_s14 = scalar_lea.hbm %s4129_s1, %s2492_s11  ;;  %p2709_p9 = pneg %p2708_p8 }
  0x27   : > { %p2714_p11 = scmp.lt.s32.totalorder %s2712_s20, %s2705_s18 }
  0x29   : > { %p2715_p12 = por %p2714_p11, %p2713_p10 }
  0x2b   : > { %p2716_p13 = pnand %p2715_p12, %p2709_p9 }
  0x2d   : > { %2719 = shalt.err (!%p2716_p13)
}
  0x2e   : > { %s4100_s6 = smov 4096   ;;  %s4101_s7 = smov 2048  }
  0x2f   : > { %s4102_s16 = smov 128   ;;  %s4130_s2 = sld [smem:[#allocation34_spill]] }
  0x30   : > { %2541 = dma.hbm_to_vmem [thread:$0]  (!%p3157_p5), %s292_s14, 32768, %s294_s19, %s3166_s30, %s4100_s6, %s4101_s7, %s4102_s16  }
  0x31   : > { %s307_s13 = scalar_lea.vmem [#allocation8], %s3150_s15  ;;  %p2503_p1 = scmp.ge.s32.totalorder %s3020_s10, 1 }
  0x32   : > { %s317_s1 = sshll.u32 %s307_s13, 4  ;;  %p378_p3 = scmp.lt.s32.totalorder %s3020_s10, 5  ;;  %s3185_s1 = int_to_ptr.vmem [resolvable:$true] %s317_s1 }
  0x33   : > { %s3194_s19 = sadd.s32 4294967295, %s3020_s10   ;;  %s43_s14 = sadd.s32 1, %s3012_s8 }
  0x34   : > { %p3189_p7 = pnand %p2503_p1, %p378_p3  ;;  %p44_p8 = scmp.ge.s32.totalorder %s43_s14, 2 }
  0x35   : > { %s3182_s20 = scalar_lea.hbm %s4130_s2, %s2492_s11  ;;  %s59_s11 = sadd.s32 1, %s3000_s29 }
  0x36   : > { %p66_p9 = scmp.ne.s32.totalorder %s3000_s29, %s2996_s28  ;;  %p72_p10 = scmp.ne.s32.totalorder %s2996_s28, %s2992_s27 }
  0x37   : > { %s4187_s14 = smov (%p44_p8, %s43_s14), 0  ;;  %s4133_s13 = sadd.s32 1, %s3016_s9 }
  0x38   : > { %4132 = sst [smem:[#allocation27_spill]] %s4187_s14  ;;  %s4189_s13 = smov (!%p44_p8, %s4133_s13), %s3016_s9 }
  0x39   : > { %s55_s15 = ssub.s32 %s3012_s8, %s4187_s14  ;;  %p68_p11 = por %p4114_p0, %p66_p9 }
  0x3a   : > { %p48_p12 = scmp.ge.s32.totalorder %s4189_s13, 2  ;;  %p57_p13 = scmp.eq.s32.totalorder %s55_s15, 0 }
  0x3b   : > { %p4113_p1 = scmp.eq.s32.totalorder %s3194_s19, 0  ;;  %s3213_s18 = sand.u32 1, %s3000_s29  }
  0x3c   : > { %s4191_s13 = smov (%p48_p12, %s4189_s13), 0  ;;  %p3242_p12 = pnand %p4112_p4, %p68_p11 }
  0x3d   : > { %4134 = sst [smem:[#allocation28_spill]] %s4191_s13  ;;  %p3222_p3 = por %p4113_p1, %p72_p10 }
  0x3e   : > { %s3218_s27 = scalar_select %p57_p13, %s3000_s29, %s59_s11  }
  0x3f   : > { %s4136_s17 = scalar_select %p3222_p3, 1, 0 }
  0x40   : > { %4135 = sst [smem:[#allocation29_spill]] %s3218_s27  ;;  %s3228_s6 = ssub.s32 %s3016_s9, %s4191_s13 }
  0x41   : > { %4137 = sst [smem:[#allocation30_spill]] %s4136_s17  ;;  %s84_s7 = sor.u32 %s3228_s6, %s55_s15 }
  0x42   : > { %p3236_p8 = por %p100_p2, %p4113_p1  ;;  %p85_p9 = scmp.eq.s32.totalorder %s84_s7, 0 }
  0x43   : > { %s2498_s2 = sshll.u32 %s3213_s18, 4  ;;  %s4141_s14 = sadd.s32 1, %s2988_s26 }
  0x44   : > { %s4138_s16 = scalar_select %p3236_p8, 1, 0 }
  0x45   : > { %s3250_s13 = scalar_select %p85_p9, %s2988_s26, %s4141_s14  }
  0x46   : > { %4139 = sst [smem:[#allocation31_spill]] %s4138_s16  ;;  %s2520_s27 = sshll.u32 %s3012_s8, 8 }
  0x47   : > { %4142 = sst [smem:[#allocation32_spill]] %s3250_s13  ;;  %s331_s15 = scalar_lea.vmem [#allocation9], %s2498_s2 }
  0x48   : > { %s339_s29 = sshll.u32 %s331_s15, 4  ;;  %s4143_s3 = sld [smem:[#allocation35_spill]]  ;;  %s340_s29 = int_to_ptr.vmem [resolvable:$true] %s339_s29 }
  0x49   : > { %s4144_s7 = sand.u32 1, %s3020_s10   ;;  %p2722_p2 = pneg %p3242_p12 }
  0x4a   : > { %s3258_s16 = scalar_lea.sflag [#allocation10], %s4144_s7  ;;  %s2733_s28 = scalar_lea.vmem %s340_s29, 256 }
  0x4b   : > { %p2734_p10 = scmp.ne.s32.totalorder %s340_s29, %s2733_s28  ;;  %s3026_s14 = smov [#allocation9]  }
  0x4c   : > { %s2738_s13 = sshll.u32 %s3026_s14, 4  ;;  %s2739_s13 = int_to_ptr.vmem [resolvable:$false] %s2738_s13 }
  0x4d   : > { %p2736_p11 = pnand %p2734_p10, %p2722_p2  ;;  %s2740_s2 = scalar_lea.vmem %s2739_s13, 512 }
  0x4e   : > { %s337_s17 = scalar_lea.hbm %s4143_s3, %s2520_s27  ;;  %p2741_p9 = scmp.lt.s32.totalorder %s340_s29, %s2739_s13 }
  0x4f   : > { %p2737_p13 = pneg %p2736_p11  ;;  %p2742_p4 = scmp.lt.s32.totalorder %s2740_s2, %s2733_s28 }
  0x51   : > { %p2743_p1 = por %p2742_p4, %p2741_p9 }
  0x53   : > { %p2744_p0 = pnand %p2743_p1, %p2737_p13 }
  0x55   : > { %2747 = shalt.err (!%p2744_p0)
}
  0x56   : > { %2547 = dma.hbm_to_vmem [thread:$0]  (!%p3242_p12), %s337_s17, 256, %s340_s29, %s3258_s16  }
  0x57   : > { %s2485_s25 = sshll.u32 %s3213_s18, 7  ;;  %s2517_s27 = sshll.u32 %s3012_s8, 11 }
  0x58   : > { %s270_s7 = scalar_lea.hbm %s4091_s0, %s2517_s27  ;;  %s262_s14 = scalar_lea.vmem [#allocation3], %s2485_s25 }
  0x59   : > { %s272_s13 = sshll.u32 %s262_s14, 4  ;;  %s259_s28 = scalar_lea.sflag [#allocation4], %s3213_s18  ;;  %s273_s13 = int_to_ptr.vmem [resolvable:$true] %s272_s13 }
  0x5a   : > { %s2761_s2 = scalar_lea.vmem %s273_s13, 2048  ;;  %s3027_s3 = smov [#allocation3]  }
  0x5b   : > { %p2762_p0 = scmp.ne.s32.totalorder %s273_s13, %s2761_s2  ;;  %s2766_s26 = sshll.u32 %s3027_s3, 4  ;;  %s2767_s26 = int_to_ptr.vmem [resolvable:$false] %s2766_s26 }
  0x5c   : > { %s2768_s29 = scalar_lea.vmem %s2767_s26, 4096  ;;  %p2769_p10 = scmp.lt.s32.totalorder %s273_s13, %s2767_s26 }
  0x5d   : > { %p2764_p4 = pnand %p2762_p0, %p2722_p2  ;;  %p2770_p11 = scmp.lt.s32.totalorder %s2768_s29, %s2761_s2 }
  0x5f   : > { %p2765_p1 = pneg %p2764_p4  ;;  %p2771_p13 = por %p2770_p11, %p2769_p10 }
  0x61   : > { %p2772_p9 = pnand %p2771_p13, %p2765_p1 }
  0x63   : > { %2775 = shalt.err (!%p2772_p9)
}
  0x64   : > { %2538 = dma.hbm_to_vmem [thread:$0]  (!%p3242_p12), %s270_s7, 2048, %s273_s13, %s259_s28  }
  0x65   : > { %s2789_s18 = scalar_lea.vmem %s3185_s1, 32768  ;;  %p4145_p2 = pneg %p3157_p5 }
  0x66   : > { %p2790_p6 = scmp.ne.s32.totalorder %s3185_s1, %s2789_s18  ;;  %s3028_s3 = smov [#allocation8]  }
  0x67   : > { %s2794_s17 = sshll.u32 %s3028_s3, 4  ;;  %s2795_s17 = int_to_ptr.vmem [resolvable:$false] %s2794_s17 }
  0x68   : > { %p2792_p0 = pnand %p2790_p6, %p4145_p2  ;;  %s2796_s26 = scalar_lea.vmem %s2795_s17, 65536 }
  0x69   : > { %p2797_p10 = scmp.lt.s32.totalorder %s3185_s1, %s2795_s17  ;;  %p2798_p1 = scmp.lt.s32.totalorder %s2796_s26, %s2789_s18 }
  0x6a   : > { %p2793_p4 = pneg %p2792_p0 }
  0x6b   : > { %p2799_p11 = por %p2798_p1, %p2797_p10 }
  0x6d   : > { %p2800_p13 = pnand %p2799_p11, %p2793_p4 }
  0x6f   : > { %2803 = shalt.err (!%p2800_p13)
}
  0x70   : > { %s4146_s11 = smov 128   ;;  %s4147_s25 = smov 2048  }
  0x71   : > { %s4148_s27 = smov 4096   ;;  %s2482_s12 = sadd.s32 4294967294, %s3020_s10  }
  0x72   : > { %2544 = dma.hbm_to_vmem [thread:$0]  (!%p3157_p5), %s3182_s20, 32768, %s3185_s1, %s3166_s30, %s4148_s27, %s4147_s25, %s4146_s11  }
  0x73   : > { %p165_p6 = scmp.eq.s32.totalorder %s3228_s6, 0  ;;  %s167_s15 = sadd.s32 1, %s2976_s23 }
  0x74   : > { %p174_p12 = scmp.ne.s32.totalorder %s2976_s23, %s2972_s22  ;;  %p180_p9 = scmp.ne.s32.totalorder %s2972_s22, %s2968_s21 }
  0x75   : > { %s3301_s24 = scalar_select %p165_p6, %s2976_s23, %s167_s15  }
  0x76   : > { %p4149_p2 = scmp.eq.s32.totalorder %s3020_s10, 0  ;;  %p4150_p4 = scmp.eq.s32.totalorder %s3194_s19, 0 }
  0x77   : > { %p232_p1 = scmp.eq.s32.totalorder %s3194_s19, 3  ;;  %p238_p11 = scmp.eq.s32.totalorder %s2482_s12, 3 }
  0x78   : > { %p176_p0 = por %p174_p12, %p4149_p2  ;;  %p3307_p10 = por %p180_p9, %p4150_p4 }
  0x79   : > { %s3313_s14 = sand.u32 1, %s2976_s23   ;;  %s2501_s1 = sshll.u32 %s3016_s9, 4 }
  0x7a   : > { %p3316_p5 = por %p232_p1, %p174_p12  ;;  %p3320_p13 = por %p238_p11, %p180_p9 }
  0x7b   : > { %s354_s28 = scalar_lea.hbm %s4095_s4, %s2501_s1  ;;  %s349_s2 = scalar_lea.vmem [#allocation11], %s3313_s14 }
  0x7c   : > { %s4153_s6 = scalar_select %p3320_p13, 1, 0 }
  0x7d   : > { %s356_s29 = sshll.u32 %s349_s2, 4  ;;  %p4154_p6 = scmp.lt.s32.totalorder %s3020_s10, 4  ;;  %s357_s29 = int_to_ptr.vmem [resolvable:$true] %s356_s29 }
  0x7e   : > { %s2817_s3 = scalar_lea.vmem %s357_s29, 16  ;;  %s3029_s17 = smov [#allocation11]  }
  0x7f   : > { %p3330_p2 = pnand %p4154_p6, %p176_p0  ;;  %p2818_p9 = scmp.ne.s32.totalorder %s357_s29, %s2817_s3 }
  0x80   : > { %s2822_s26 = sshll.u32 %s3029_s17, 4  ;;  %s2823_s26 = int_to_ptr.vmem [resolvable:$false] %s2822_s26 }
  0x81   : > { %p2806_p12 = pneg %p3330_p2  ;;  %s2824_s11 = scalar_lea.vmem %s2823_s26, 32 }
  0x82   : > { %p2825_p11 = scmp.lt.s32.totalorder %s357_s29, %s2823_s26  ;;  %p2826_p0 = scmp.lt.s32.totalorder %s2824_s11, %s2817_s3 }
  0x83   : > { %p2820_p4 = pnand %p2818_p9, %p2806_p12 }
  0x84   : > { %p2827_p6 = por %p2826_p0, %p2825_p11 }
  0x85   : > { %p2821_p1 = pneg %p2820_p4 }
  0x87   : > { %p2828_p13 = pnand %p2827_p6, %p2821_p1 }
  0x89   : > { %2831 = shalt.err (!%p2828_p13)
}
  0x8a   : > { %2550 = dma.hbm_to_vmem [thread:$0]  (!%p3330_p2), %s354_s28, 16, %s357_s29, %s3258_s16  }
  0x8b   : > { %s4156_s12 = sld [smem:[#allocation36_spill]]  ;;  %s366_s20 = scalar_lea.vmem [#allocation12], %s3313_s14 }
  0x8c   : > { %s373_s13 = sshll.u32 %s366_s20, 4  ;;  %s364_s2 = scalar_lea.sflag [#allocation13], %s3313_s14  ;;  %s374_s13 = int_to_ptr.vmem [resolvable:$true] %s373_s13 }
  0x8d   : > { %s2845_s17 = scalar_lea.vmem %s374_s13, 16  ;;  %s3030_s3 = smov [#allocation12]  }
  0x8e   : > { %p2846_p9 = scmp.ne.s32.totalorder %s374_s13, %s2845_s17  ;;  %s2850_s26 = sshll.u32 %s3030_s3, 4  ;;  %s2851_s26 = int_to_ptr.vmem [resolvable:$false] %s2850_s26 }
  0x8f   : > { %s2852_s11 = scalar_lea.vmem %s2851_s26, 32  ;;  %p2853_p1 = scmp.lt.s32.totalorder %s374_s13, %s2851_s26 }
  0x90   : > { %p2848_p13 = pnand %p2846_p9, %p2806_p12  ;;  %p2854_p11 = scmp.lt.s32.totalorder %s2852_s11, %s2845_s17 }
  0x91   : > { %s371_s15 = scalar_lea.hbm %s4156_s12, %s2501_s1 }
  0x92   : > { %p2849_p4 = pneg %p2848_p13  ;;  %p2855_p0 = por %p2854_p11, %p2853_p1 }
  0x94   : > { %p2856_p6 = pnand %p2855_p0, %p2849_p4 }
  0x96   : > { %2859 = shalt.err (!%p2856_p6)
}
  0x97   : > { %2553 = dma.hbm_to_vmem [thread:$0]  (!%p3330_p2), %s371_s15, 16, %s374_s13, %s364_s2  }
  0x98   : > { %382 = sbr.rel (%p3189_p7) target bundleno = 942 (0x3ae), region = 44  ;;  %s4157_s16 = sld [smem:[#allocation23_spill]] (!%p3189_p7) }
  0x9e   : > { %s384_s1 = sand.u32 1, %s4157_s16  }
  0x9f   : > { %s2504_s28 = sshll.u32 %s384_s1, 7  ;;  %s385_s29 = scalar_lea.sflag [#allocation4], %s384_s1 }
  0xa0   : > { %s3355_s25 = scalar_lea.vmem [#allocation3], %s2504_s28 }
  0xa1   : > { %2943 = dma.done.wait (%p3222_p3), %s385_s29, 2048  }
  0xa2   : > { %2945 = vsyncadd (%p3222_p3), %s385_s29, 4294965248  ;;  %s4159_s27 = sld [smem:[#allocation21_spill]]  ;;  %s393_s18 = sand.u32 1, %s3194_s19  }
  0xa3   : > { %s394_s5 = scalar_lea.sflag [#allocation7], %s393_s18 }
  0xa8   : > { %s395_s15 = sand.u32 1, %s4159_s27  }
  0xa9   : > { %s2505_s20 = sshll.u32 %s395_s15, 11 }
  0xaa   : > { %s3363_s13 = scalar_lea.vmem [#allocation6], %s2505_s20 }
  0xab   : > { %2947 = dma.done.wait (%p3236_p8), %s394_s5, 65536  }
  0xac   : > { %2949 = vsyncadd (%p3236_p8), %s394_s5, 4294901760  ;;  %s2507_s2 = sshll.u32 %s384_s1, 4  ;;  %s3369_s17 = scalar_lea.vmem [#allocation8], %s2505_s20 }
  0xad   : > { %s412_s3 = scalar_lea.sflag [#allocation10], %s393_s18  ;;  %s3371_s26 = scalar_lea.vmem [#allocation9], %s2507_s2 }
  0xae   : > { %2951 = dma.done.wait (%p3222_p3), %s412_s3, 256  }
  0xaf   : > { %2953 = vsyncadd (%p3222_p3), %s412_s3, 4294967040  ;;  %s3378_s19 = sand.u32 1, %s2972_s22  }
  0xb0   : > { %s423_s11 = scalar_lea.vmem [#allocation11], %s3378_s19 }
  0xb1   : > { %2955 = dma.done.wait (%p3307_p10), %s412_s3, 16  }
  0xb2   : > { %2957 = vsyncadd (%p3307_p10), %s412_s3, 4294967280  ;;  %s429_s16 = scalar_lea.sflag [#allocation13], %s3378_s19  ;;  %s431_s1 = scalar_lea.vmem [#allocation12], %s3378_s19 }
  0xb3   : > { %2959 = dma.done.wait (%p3307_p10), %s429_s16, 16  }
  0xb4   : > { %2961 = vsyncadd (%p3307_p10), %s429_s16, 4294967280  ;;  %s2508_s14 = sshll.u32 %s3378_s19, 3  ;;  %s4161_s29 = sld [smem:[#allocation25_spill]] }
  0xb5   : > { %s3392_s28 = scalar_lea.vmem [#allocation14], %s2508_s14 }
  0xba   : > { %p2509_p7 = scmp.ne.s32.totalorder %s4161_s29, 0 }
  0xbc   : > { %492 = sbr.rel (%p2509_p7) target bundleno = 195 (0xc3), region = 72 }
  0xc1   : > { %v3031_v0 = vmov 0.0  }
  0xc2   : > { %493 = vst [vmem:[#allocation2] sm:$0xff] %v3031_v0 }
  0xc3 PF: > { %v1107_v1 = vld [vmem:[%s3369_s17 + $0x788] sm:$0xff]  ;;  %v1109_v2 = vld [vmem:[%s3369_s17 + $0x798] sm:$0xff]  ;;  %v1106_v3 = vld [vmem:[%s3369_s17 + $0x780] sm:$0xff]  ;;  %v770_v15 = vlaneseq  ;;  %s4162_s7 = sld [smem:[#allocation25_spill]] }
  0xc4   : > { %1122 = vmatprep.subr.mxu0 %v1107_v1  ;;  %1192 = vmatprep.subr.mxu1 %v1109_v2  ;;  %v1108_v4 = vld [vmem:[%s3369_s17 + $0x790] sm:$0xff]  ;;  %v1091_v5 = vld [vmem:[%s3369_s17 + $0x708] sm:$0xff]  ;;  %v1093_v6 = vld [vmem:[%s3369_s17 + $0x718] sm:$0xff] }
  0xc5   : > { %1123 = vmatpush1.xpose.msra.mxu0 %v1106_v3  ;;  %1193 = vmatpush1.xpose.msra.mxu1 %v1108_v4  ;;  %v1090_v7 = vld [vmem:[%s3369_s17 + $0x700] sm:$0xff]  ;;  %v1092_v8 = vld [vmem:[%s3369_s17 + $0x710] sm:$0xff]  ;;  %v1075_v9 = vld [vmem:[%s3369_s17 + $0x688] sm:$0xff]  ;;  %v3413_v20 = vshrl.u32 %v770_v15, 7 }
  0xc6   : > { %1124 = vmatprep.subr.mxu0 %v1091_v5  ;;  %1194 = vmatprep.subr.mxu1 %v1093_v6  ;;  %v1077_v10 = vld [vmem:[%s3369_s17 + $0x698] sm:$0xff]  ;;  %v1074_v11 = vld [vmem:[%s3369_s17 + $0x680] sm:$0xff]  ;;  %v1076_v12 = vld [vmem:[%s3369_s17 + $0x690] sm:$0xff] }
  0xc7   : > { %v1059_v13 = vld [vmem:[%s3369_s17 + $0x608] sm:$0xff]  ;;  %v1061_v14 = vld [vmem:[%s3369_s17 + $0x618] sm:$0xff]  ;;  %v1058_v16 = vld [vmem:[%s3369_s17 + $0x600] sm:$0xff]  ;;  %v776_v25 = vsub.s32 1, %v3413_v20  ;;  %v784_v26 = vsub.s32 3, %v3413_v20  ;;  %v772_v6 = vsub.s32 0, %v3413_v20 }
  0xc8   : > { %v1060_v17 = vld [vmem:[%s3369_s17 + $0x610] sm:$0xff]  ;;  %v1043_v18 = vld [vmem:[%s3369_s17 + $0x588] sm:$0xff]  ;;  %v1045_v19 = vld [vmem:[%s3369_s17 + $0x598] sm:$0xff] }
  0xc9   : > { %1125 = vmatpush1.xpose.msra.mxu0 %v1090_v7  ;;  %1195 = vmatpush1.xpose.msra.mxu1 %v1092_v8  ;;  %v1042_v21 = vld [vmem:[%s3369_s17 + $0x580] sm:$0xff]  ;;  %v1044_v22 = vld [vmem:[%s3369_s17 + $0x590] sm:$0xff]  ;;  %v1027_v23 = vld [vmem:[%s3369_s17 + $0x508] sm:$0xff]  ;;  %v780_v7 = vsub.s32 2, %v3413_v20  ;;  %p2511_p3 = scmp.ne.s32.totalorder %s4162_s7, 1 }
  0xca   : > { %1126 = vmatprep.subr.mxu0 %v1075_v9  ;;  %1196 = vmatprep.subr.mxu1 %v1077_v10  ;;  %v1029_v24 = vld [vmem:[%s3369_s17 + $0x518] sm:$0xff]  ;;  %v1026_v27 = vld [vmem:[%s3369_s17 + $0x500] sm:$0xff]  ;;  %v1028_v28 = vld [vmem:[%s3369_s17 + $0x510] sm:$0xff] }
  0xcb   : > { %v1011_v29 = vld [vmem:[%s3369_s17 + $0x488] sm:$0xff]  ;;  %v1013_v30 = vld [vmem:[%s3369_s17 + $0x498] sm:$0xff]  ;;  %v3427_v32 = vld [vmem:[%s3371_s26] sm:$0xff] }
  0xcc   : > { %v495_v31 = vld [vmem:[%s3355_s25 + $0x8] sm:$0xff]  ;;  %v777_v33 = vrot.slane %v3427_v32, %v776_v25  ;;  %v497_v34 = vld [vmem:[%s3355_s25 + $0x18] sm:$0xff]  ;;  %v785_v35 = vrot.slane %v3427_v32, %v784_v26  ;;  %v1010_v36 = vld [vmem:[%s3369_s17 + $0x480] sm:$0xff]  ;;  %v781_v15 = vrot.slane %v3427_v32, %v780_v7 }
  0xcd   : > { %1127 = vmatpush1.xpose.msra.mxu0 %v1074_v11  ;;  %1197 = vmatpush1.xpose.msra.mxu1 %v1076_v12  ;;  %v1012_v37 = vld [vmem:[%s3369_s17 + $0x490] sm:$0xff]  ;;  %v995_v38 = vld [vmem:[%s3369_s17 + $0x408] sm:$0xff]  ;;  %v997_v39 = vld [vmem:[%s3369_s17 + $0x418] sm:$0xff]  ;;  %v792_v12 = vsub.s32 5, %v3413_v20 }
  0xce   : > { %1128 = vmatprep.subr.mxu0 %v1059_v13  ;;  %1198 = vmatprep.subr.mxu1 %v1061_v14  ;;  %v851_v40 = vmul.f32 %v777_v33, %v495_v31  ;;  %v853_v41 = vmul.f32 %v785_v35, %v497_v34  ;;  %v994_v42 = vld [vmem:[%s3369_s17 + $0x400] sm:$0xff]  ;;  %v996_v43 = vld [vmem:[%s3369_s17 + $0x410] sm:$0xff]  ;;  %v979_v44 = vld [vmem:[%s3369_s17 + $0x388] sm:$0xff]  ;;  %v800_v13 = vsub.s32 7, %v3413_v20  ;;  %v773_v14 = vrot.slane %v3427_v32, %v772_v6 }
  0xcf   : > { %v981_v45 = vld [vmem:[%s3369_s17 + $0x398] sm:$0xff]  ;;  %v978_v46 = vld [vmem:[%s3369_s17 + $0x380] sm:$0xff]  ;;  %v980_v47 = vld [vmem:[%s3369_s17 + $0x390] sm:$0xff] }
  0xd0   : > { %1186 = vmatprep.mubr.f32.mxu0 %v851_v40  ;;  %1256 = vmatprep.mubr.f32.mxu1 %v853_v41  ;;  %v963_v48 = vld [vmem:[%s3369_s17 + $0x308] sm:$0xff]  ;;  %v965_v49 = vld [vmem:[%s3369_s17 + $0x318] sm:$0xff]  ;;  %v962_v50 = vld [vmem:[%s3369_s17 + $0x300] sm:$0xff] }
  0xd1   : > { %1129 = vmatpush1.xpose.msra.mxu0 %v1058_v16  ;;  %1199 = vmatpush1.xpose.msra.mxu1 %v1060_v17  ;;  %v964_v51 = vld [vmem:[%s3369_s17 + $0x310] sm:$0xff]  ;;  %v947_v52 = vld [vmem:[%s3369_s17 + $0x288] sm:$0xff]  ;;  %v949_v53 = vld [vmem:[%s3369_s17 + $0x298] sm:$0xff] }
  0xd2   : > { %1130 = vmatprep.subr.mxu0 %v1043_v18  ;;  %1200 = vmatprep.subr.mxu1 %v1045_v19  ;;  %v946_v54 = vld [vmem:[%s3369_s17 + $0x280] sm:$0xff]  ;;  %v948_v55 = vld [vmem:[%s3369_s17 + $0x290] sm:$0xff]  ;;  %v931_v56 = vld [vmem:[%s3369_s17 + $0x208] sm:$0xff] }
  0xd3   : > { %v933_v57 = vld [vmem:[%s3369_s17 + $0x218] sm:$0xff]  ;;  %v930_v58 = vld [vmem:[%s3369_s17 + $0x200] sm:$0xff]  ;;  %v932_v59 = vld [vmem:[%s3369_s17 + $0x210] sm:$0xff] }
  0xd4   : > { %v915_v60 = vld [vmem:[%s3369_s17 + $0x188] sm:$0xff]  ;;  %v917_v61 = vld [vmem:[%s3369_s17 + $0x198] sm:$0xff]  ;;  %v914_v62 = vld [vmem:[%s3369_s17 + $0x180] sm:$0xff] }
  0xd5   : > { %1131 = vmatpush1.xpose.msra.mxu0 %v1042_v21  ;;  %1201 = vmatpush1.xpose.msra.mxu1 %v1044_v22  ;;  %v916_v63 = vld [vmem:[%s3369_s17 + $0x190] sm:$0xff]  ;;  %v899_v0 = vld [vmem:[%s3369_s17 + $0x108] sm:$0xff]  ;;  %v901_v1 = vld [vmem:[%s3369_s17 + $0x118] sm:$0xff] }
  0xd6   : > { %1132 = vmatprep.subr.mxu0 %v1027_v23  ;;  %1202 = vmatprep.subr.mxu1 %v1029_v24  ;;  %v898_v2 = vld [vmem:[%s3369_s17 + $0x100] sm:$0xff]  ;;  %v900_v3 = vld [vmem:[%s3369_s17 + $0x110] sm:$0xff]  ;;  %v883_v4 = vld [vmem:[%s3369_s17 + $0x88] sm:$0xff]  ;;  %v793_v23 = vrot.slane %v3427_v32, %v792_v12  ;;  %v801_v24 = vrot.slane %v3427_v32, %v800_v13 }
  0xd7   : > { %v885_v5 = vld [vmem:[%s3369_s17 + $0x98] sm:$0xff]  ;;  %v882_v8 = vld [vmem:[%s3369_s17 + $0x80] sm:$0xff]  ;;  %v884_v9 = vld [vmem:[%s3369_s17 + $0x90] sm:$0xff] }
  0xd8   : > { %v867_v10 = vld [vmem:[%s3369_s17 + $0x8] sm:$0xff]  ;;  %v869_v11 = vld [vmem:[%s3369_s17 + $0x18] sm:$0xff]  ;;  %v494_v16 = vld [vmem:[%s3355_s25] sm:$0xff] }
  0xd9   : > { %1133 = vmatpush1.xpose.msra.mxu0 %v1026_v27  ;;  %1203 = vmatpush1.xpose.msra.mxu1 %v1028_v28  ;;  %v496_v17 = vld [vmem:[%s3355_s25 + $0x10] sm:$0xff]  ;;  %v866_v18 = vld [vmem:[%s3369_s17] sm:$0xff]  ;;  %v1111_v21 = vld [vmem:[%s3369_s17 + $0x7a8] sm:$0xff]  ;;  %v850_v27 = vmul.f32 %v773_v14, %v494_v16 }
  0xda   : > { %1134 = vmatprep.subr.mxu0 %v1011_v29  ;;  %1204 = vmatprep.subr.mxu1 %v1013_v30  ;;  %v868_v19 = vld [vmem:[%s3369_s17 + $0x10] sm:$0xff]  ;;  %v1113_v22 = vld [vmem:[%s3369_s17 + $0x7b8] sm:$0xff]  ;;  %v852_v28 = vmul.f32 %v781_v15, %v496_v17  ;;  %v499_v29 = vld [vmem:[%s3355_s25 + $0x28] sm:$0xff] }
  0xdb   : > { %v501_v30 = vld [vmem:[%s3355_s25 + $0x38] sm:$0xff]  ;;  %v1110_v31 = vld [vmem:[%s3369_s17 + $0x7a0] sm:$0xff]  ;;  %v1112_v33 = vld [vmem:[%s3369_s17 + $0x7b0] sm:$0xff] }
  0xdc   : > { %v1095_v34 = vld [vmem:[%s3369_s17 + $0x728] sm:$0xff]  ;;  %v1097_v35 = vld [vmem:[%s3369_s17 + $0x738] sm:$0xff]  ;;  %v950_v14 = vld [vmem:[%s3369_s17 + $0x2a0] sm:$0xff] }
  0xdd   : > { %1135 = vmatpush1.xpose.msra.mxu0 %v1010_v36  ;;  %1205 = vmatpush1.xpose.msra.mxu1 %v1012_v37  ;;  %v855_v36 = vmul.f32 %v793_v23, %v499_v29  ;;  %v857_v37 = vmul.f32 %v801_v24, %v501_v30  ;;  %v1079_v40 = vld [vmem:[%s3369_s17 + $0x6a8] sm:$0xff]  ;;  %v1081_v41 = vld [vmem:[%s3369_s17 + $0x6b8] sm:$0xff]  ;;  %v952_v15 = vld [vmem:[%s3369_s17 + $0x2b0] sm:$0xff] }
  0xde   : > { %1136 = vmatprep.subr.mxu0 %v995_v38  ;;  %1206 = vmatprep.subr.mxu1 %v997_v39  ;;  %v1094_v38 = vld [vmem:[%s3369_s17 + $0x720] sm:$0xff]  ;;  %v1096_v39 = vld [vmem:[%s3369_s17 + $0x730] sm:$0xff]  ;;  %v935_v16 = vld [vmem:[%s3369_s17 + $0x228] sm:$0xff] }
  0xdf   : > { %v937_v17 = vld [vmem:[%s3369_s17 + $0x238] sm:$0xff]  ;;  %v918_v23 = vld [vmem:[%s3369_s17 + $0x1a0] sm:$0xff]  ;;  %v920_v24 = vld [vmem:[%s3369_s17 + $0x1b0] sm:$0xff] }
  0xe0   : > { %v902_v29 = vld [vmem:[%s3369_s17 + $0x120] sm:$0xff]  ;;  %v904_v30 = vld [vmem:[%s3369_s17 + $0x130] sm:$0xff] }
  0xe1   : > { %1137 = vmatpush1.xpose.msra.mxu0 %v994_v42  ;;  %1207 = vmatpush1.xpose.msra.mxu1 %v996_v43  ;;  %v1078_v42 = vld [vmem:[%s3369_s17 + $0x6a0] sm:$0xff]  ;;  %v1080_v43 = vld [vmem:[%s3369_s17 + $0x6b0] sm:$0xff] }
  0xe2   : > { %1138 = vmatprep.subr.mxu0 %v979_v44  ;;  %1208 = vmatprep.subr.mxu1 %v981_v45  ;;  %v1063_v44 = vld [vmem:[%s3369_s17 + $0x628] sm:$0xff]  ;;  %v1065_v45 = vld [vmem:[%s3369_s17 + $0x638] sm:$0xff] }
  0xe5   : > { %1139 = vmatpush1.xpose.msra.mxu0 %v978_v46  ;;  %1209 = vmatpush1.xpose.msra.mxu1 %v980_v47  ;;  %v1062_v46 = vld [vmem:[%s3369_s17 + $0x620] sm:$0xff]  ;;  %v1064_v47 = vld [vmem:[%s3369_s17 + $0x630] sm:$0xff] }
  0xe6   : > { %1140 = vmatprep.subr.mxu0 %v963_v48  ;;  %1210 = vmatprep.subr.mxu1 %v965_v49  ;;  %v1047_v48 = vld [vmem:[%s3369_s17 + $0x5a8] sm:$0xff]  ;;  %v1049_v49 = vld [vmem:[%s3369_s17 + $0x5b8] sm:$0xff] }
  0xe9   : > { %1141 = vmatpush1.xpose.msra.mxu0 %v962_v50  ;;  %1211 = vmatpush1.xpose.msra.mxu1 %v964_v51  ;;  %v1046_v50 = vld [vmem:[%s3369_s17 + $0x5a0] sm:$0xff]  ;;  %v1048_v51 = vld [vmem:[%s3369_s17 + $0x5b0] sm:$0xff] }
  0xea   : > { %1142 = vmatprep.subr.mxu0 %v947_v52  ;;  %1212 = vmatprep.subr.mxu1 %v949_v53  ;;  %v1031_v52 = vld [vmem:[%s3369_s17 + $0x528] sm:$0xff]  ;;  %v1033_v53 = vld [vmem:[%s3369_s17 + $0x538] sm:$0xff] }
  0xed   : > { %1143 = vmatpush1.xpose.msra.mxu0 %v946_v54  ;;  %1213 = vmatpush1.xpose.msra.mxu1 %v948_v55  ;;  %v1030_v54 = vld [vmem:[%s3369_s17 + $0x520] sm:$0xff]  ;;  %v1032_v55 = vld [vmem:[%s3369_s17 + $0x530] sm:$0xff] }
  0xee   : > { %1144 = vmatprep.subr.mxu0 %v931_v56  ;;  %1214 = vmatprep.subr.mxu1 %v933_v57  ;;  %v1015_v56 = vld [vmem:[%s3369_s17 + $0x4a8] sm:$0xff]  ;;  %v1017_v57 = vld [vmem:[%s3369_s17 + $0x4b8] sm:$0xff] }
  0xf1   : > { %1145 = vmatpush1.xpose.msra.mxu0 %v930_v58  ;;  %1215 = vmatpush1.xpose.msra.mxu1 %v932_v59  ;;  %v1014_v58 = vld [vmem:[%s3369_s17 + $0x4a0] sm:$0xff]  ;;  %v1016_v59 = vld [vmem:[%s3369_s17 + $0x4b0] sm:$0xff] }
  0xf2   : > { %1146 = vmatprep.subr.mxu0 %v915_v60  ;;  %1216 = vmatprep.subr.mxu1 %v917_v61  ;;  %v999_v60 = vld [vmem:[%s3369_s17 + $0x428] sm:$0xff]  ;;  %v1001_v61 = vld [vmem:[%s3369_s17 + $0x438] sm:$0xff] }
  0xf5   : > { %1147 = vmatpush1.xpose.msra.mxu0 %v914_v62  ;;  %1217 = vmatpush1.xpose.msra.mxu1 %v916_v63  ;;  %v998_v62 = vld [vmem:[%s3369_s17 + $0x420] sm:$0xff]  ;;  %v1000_v63 = vld [vmem:[%s3369_s17 + $0x430] sm:$0xff] }
  0xf6   : > { %1148 = vmatprep.subr.mxu0 %v899_v0  ;;  %1218 = vmatprep.subr.mxu1 %v901_v1  ;;  %v983_v0 = vld [vmem:[%s3369_s17 + $0x3a8] sm:$0xff]  ;;  %v985_v1 = vld [vmem:[%s3369_s17 + $0x3b8] sm:$0xff] }
  0xf9   : > { %1149 = vmatpush1.xpose.msra.mxu0 %v898_v2  ;;  %1219 = vmatpush1.xpose.msra.mxu1 %v900_v3  ;;  %v982_v2 = vld [vmem:[%s3369_s17 + $0x3a0] sm:$0xff]  ;;  %v984_v3 = vld [vmem:[%s3369_s17 + $0x3b0] sm:$0xff] }
  0xfa   : > { %1150 = vmatprep.subr.mxu0 %v883_v4  ;;  %1220 = vmatprep.subr.mxu1 %v885_v5  ;;  %v967_v4 = vld [vmem:[%s3369_s17 + $0x328] sm:$0xff]  ;;  %v969_v5 = vld [vmem:[%s3369_s17 + $0x338] sm:$0xff] }
  0xfd   : > { %1151 = vmatpush1.xpose.msra.mxu0 %v882_v8  ;;  %1221 = vmatpush1.xpose.msra.mxu1 %v884_v9  ;;  %v966_v8 = vld [vmem:[%s3369_s17 + $0x320] sm:$0xff]  ;;  %v968_v9 = vld [vmem:[%s3369_s17 + $0x330] sm:$0xff] }
  0xfe   : > { %1152 = vmatprep.subr.mxu0 %v867_v10  ;;  %1222 = vmatprep.subr.mxu1 %v869_v11  ;;  %v951_v10 = vld [vmem:[%s3369_s17 + $0x2a8] sm:$0xff]  ;;  %v953_v11 = vld [vmem:[%s3369_s17 + $0x2b8] sm:$0xff] }
 0x101   : > { %1153 = vmatpush1.xpose.msra.mxu0 %v866_v18  ;;  %1223 = vmatpush1.xpose.msra.mxu1 %v868_v19  ;;  %v934_v18 = vld [vmem:[%s3369_s17 + $0x220] sm:$0xff]  ;;  %v936_v19 = vld [vmem:[%s3369_s17 + $0x230] sm:$0xff] }
 0x102   : > { %1262 = vmatprep.subr.mxu0 %v1111_v21  ;;  %1332 = vmatprep.subr.mxu1 %v1113_v22  ;;  %v919_v21 = vld [vmem:[%s3369_s17 + $0x1a8] sm:$0xff]  ;;  %v921_v22 = vld [vmem:[%s3369_s17 + $0x1b8] sm:$0xff] }
 0x104   : > { %1187 = vmatmul.mubr.f32.vlgmr.msra.gmra.mxu0 %v850_v27  ;;  %1257 = vmatmul.mubr.f32.vlgmr.msra.gmra.mxu1 %v852_v28  ;;  %v903_v27 = vld [vmem:[%s3369_s17 + $0x128] sm:$0xff]  ;;  %v905_v28 = vld [vmem:[%s3369_s17 + $0x138] sm:$0xff] }
 0x105   : > { %1263 = vmatpush1.xpose.msra.mxu0 %v1110_v31  ;;  %1333 = vmatpush1.xpose.msra.mxu1 %v1112_v33  ;;  %v887_v31 = vld [vmem:[%s3369_s17 + $0xa8] sm:$0xff]  ;;  %v889_v33 = vld [vmem:[%s3369_s17 + $0xb8] sm:$0xff] }
 0x106   : > { %1264 = vmatprep.subr.mxu0 %v1095_v34  ;;  %1334 = vmatprep.subr.mxu1 %v1097_v35  ;;  %v788_v34 = vsub.s32 4, %v3413_v20  ;;  %v796_v35 = vsub.s32 6, %v3413_v20  ;;  %v750_v20 = vld [vmem:[%s3363_s13 + $0x780] sm:$0xff] }
 0x107   : > { %1326 = vmatprep.mubr.f32.mxu0 %v855_v36  ;;  %1396 = vmatprep.mubr.f32.mxu1 %v857_v37  ;;  %v886_v36 = vld [vmem:[%s3369_s17 + $0xa0] sm:$0xff]  ;;  %v888_v37 = vld [vmem:[%s3369_s17 + $0xb0] sm:$0xff] }
 0x109   : > { %1265 = vmatpush1.xpose.msra.mxu0 %v1094_v38  ;;  %1335 = vmatpush1.xpose.msra.mxu1 %v1096_v39  ;;  %v871_v38 = vld [vmem:[%s3369_s17 + $0x28] sm:$0xff]  ;;  %v873_v39 = vld [vmem:[%s3369_s17 + $0x38] sm:$0xff] }
 0x10a   : > { %1266 = vmatprep.subr.mxu0 %v1079_v40  ;;  %1336 = vmatprep.subr.mxu1 %v1081_v41  ;;  %v789_v40 = vrot.slane %v3427_v32, %v788_v34  ;;  %v797_v41 = vrot.slane %v3427_v32, %v796_v35 }
 0x10d   : > { %1267 = vmatpush1.xpose.msra.mxu0 %v1078_v42  ;;  %1337 = vmatpush1.xpose.msra.mxu1 %v1080_v43  ;;  %v3565_v42 = vld [vmem:[%s3371_s26 + $0x8] sm:$0xff]  ;;  %v498_v43 = vld [vmem:[%s3355_s25 + $0x20] sm:$0xff] }
 0x10e   : > { %1268 = vmatprep.subr.mxu0 %v1063_v44  ;;  %1338 = vmatprep.subr.mxu1 %v1065_v45  ;;  %v500_v44 = vld [vmem:[%s3355_s25 + $0x30] sm:$0xff]  ;;  %v870_v45 = vld [vmem:[%s3369_s17 + $0x20] sm:$0xff]  ;;  %v809_v32 = vrot.slane %v3565_v42, %v776_v25  ;;  %v1101_v25 = vld [vmem:[%s3369_s17 + $0x758] sm:$0xff] }
 0x111   : > { %1269 = vmatpush1.xpose.msra.mxu0 %v1062_v46  ;;  %1339 = vmatpush1.xpose.msra.mxu1 %v1064_v47  ;;  %v872_v46 = vld [vmem:[%s3369_s17 + $0x30] sm:$0xff]  ;;  %v1115_v47 = vld [vmem:[%s3369_s17 + $0x7c8] sm:$0xff] }
 0x112   : > { %1270 = vmatprep.subr.mxu0 %v1047_v48  ;;  %1340 = vmatprep.subr.mxu1 %v1049_v49  ;;  %v1117_v48 = vld [vmem:[%s3369_s17 + $0x7d8] sm:$0xff]  ;;  %v817_v49 = vrot.slane %v3565_v42, %v784_v26  ;;  %v1098_v26 = vld [vmem:[%s3369_s17 + $0x740] sm:$0xff] }
 0x115   : > { %1271 = vmatpush1.xpose.msra.mxu0 %v1046_v50  ;;  %1341 = vmatpush1.xpose.msra.mxu1 %v1048_v51  ;;  %v854_v50 = vmul.f32 %v789_v40, %v498_v43  ;;  %v856_v51 = vmul.f32 %v797_v41, %v500_v44  ;;  %v954_v40 = vld [vmem:[%s3369_s17 + $0x2c0] sm:$0xff]  ;;  %v956_v41 = vld [vmem:[%s3369_s17 + $0x2d0] sm:$0xff]  ;;  %v939_v43 = vld [vmem:[%s3369_s17 + $0x248] sm:$0xff] }
 0x116   : > { %1272 = vmatprep.subr.mxu0 %v1031_v52  ;;  %1342 = vmatprep.subr.mxu1 %v1033_v53  ;;  %v503_v52 = vld [vmem:[%s3355_s25 + $0x48] sm:$0xff]  ;;  %v505_v53 = vld [vmem:[%s3355_s25 + $0x58] sm:$0xff] }
 0x117   : > { %v941_v44 = vld [vmem:[%s3369_s17 + $0x258] sm:$0xff] }
 0x119   : > { %1273 = vmatpush1.xpose.msra.mxu0 %v1030_v54  ;;  %1343 = vmatpush1.xpose.msra.mxu1 %v1032_v55  ;;  %v1114_v54 = vld [vmem:[%s3369_s17 + $0x7c0] sm:$0xff]  ;;  %v1116_v55 = vld [vmem:[%s3369_s17 + $0x7d0] sm:$0xff] }
 0x11a   : > { %1274 = vmatprep.subr.mxu0 %v1015_v56  ;;  %1344 = vmatprep.subr.mxu1 %v1017_v57  ;;  %v1099_v56 = vld [vmem:[%s3369_s17 + $0x748] sm:$0xff]  ;;  %v859_v57 = vmul.f32 %v809_v32, %v503_v52  ;;  %v922_v32 = vld [vmem:[%s3369_s17 + $0x1c0] sm:$0xff] }
 0x11b   : > { %v906_v52 = vld [vmem:[%s3369_s17 + $0x140] sm:$0xff] }
 0x11d   : > { %1275 = vmatpush1.xpose.msra.mxu0 %v1014_v58  ;;  %1345 = vmatpush1.xpose.msra.mxu1 %v1016_v59  ;;  %v861_v58 = vmul.f32 %v817_v49, %v505_v53  ;;  %v1100_v59 = vld [vmem:[%s3369_s17 + $0x750] sm:$0xff] }
 0x11e   : > { %1276 = vmatprep.subr.mxu0 %v999_v60  ;;  %1346 = vmatprep.subr.mxu1 %v1001_v61  ;;  %v1083_v60 = vld [vmem:[%s3369_s17 + $0x6c8] sm:$0xff]  ;;  %v1085_v61 = vld [vmem:[%s3369_s17 + $0x6d8] sm:$0xff]  ;;  %v924_v49 = vld [vmem:[%s3369_s17 + $0x1d0] sm:$0xff] }
 0x11f   : > { %v908_v53 = vld [vmem:[%s3369_s17 + $0x150] sm:$0xff] }
 0x121   : > { %1277 = vmatpush1.xpose.msra.mxu0 %v998_v62  ;;  %1347 = vmatpush1.xpose.msra.mxu1 %v1000_v63  ;;  %v1082_v62 = vld [vmem:[%s3369_s17 + $0x6c0] sm:$0xff]  ;;  %v1084_v63 = vld [vmem:[%s3369_s17 + $0x6d0] sm:$0xff] }
 0x122   : > { %1278 = vmatprep.subr.mxu0 %v983_v0  ;;  %1348 = vmatprep.subr.mxu1 %v985_v1  ;;  %v1067_v0 = vld [vmem:[%s3369_s17 + $0x648] sm:$0xff]  ;;  %v1069_v1 = vld [vmem:[%s3369_s17 + $0x658] sm:$0xff] }
 0x125   : > { %1279 = vmatpush1.xpose.msra.mxu0 %v982_v2  ;;  %1349 = vmatpush1.xpose.msra.mxu1 %v984_v3  ;;  %v1066_v2 = vld [vmem:[%s3369_s17 + $0x640] sm:$0xff]  ;;  %v1068_v3 = vld [vmem:[%s3369_s17 + $0x650] sm:$0xff] }
 0x126   : > { %1280 = vmatprep.subr.mxu0 %v967_v4  ;;  %1350 = vmatprep.subr.mxu1 %v969_v5  ;;  %v1051_v4 = vld [vmem:[%s3369_s17 + $0x5c8] sm:$0xff]  ;;  %v1053_v5 = vld [vmem:[%s3369_s17 + $0x5d8] sm:$0xff] }
 0x129   : > { %1281 = vmatpush1.xpose.msra.mxu0 %v966_v8  ;;  %1351 = vmatpush1.xpose.msra.mxu1 %v968_v9  ;;  %v1050_v8 = vld [vmem:[%s3369_s17 + $0x5c0] sm:$0xff]  ;;  %v1052_v9 = vld [vmem:[%s3369_s17 + $0x5d0] sm:$0xff] }
 0x12a   : > { %1282 = vmatprep.subr.mxu0 %v951_v10  ;;  %1352 = vmatprep.subr.mxu1 %v953_v11  ;;  %v1035_v10 = vld [vmem:[%s3369_s17 + $0x548] sm:$0xff]  ;;  %v1037_v11 = vld [vmem:[%s3369_s17 + $0x558] sm:$0xff] }
 0x12d   : > { %1283 = vmatpush1.xpose.msra.mxu0 %v950_v14  ;;  %1353 = vmatpush1.xpose.msra.mxu1 %v952_v15  ;;  %v1034_v14 = vld [vmem:[%s3369_s17 + $0x540] sm:$0xff]  ;;  %v1036_v15 = vld [vmem:[%s3369_s17 + $0x550] sm:$0xff] }
 0x12e   : > { %1284 = vmatprep.subr.mxu0 %v935_v16  ;;  %1354 = vmatprep.subr.mxu1 %v937_v17  ;;  %v1019_v16 = vld [vmem:[%s3369_s17 + $0x4c8] sm:$0xff]  ;;  %v1021_v17 = vld [vmem:[%s3369_s17 + $0x4d8] sm:$0xff] }
 0x131   : > { %1285 = vmatpush1.xpose.msra.mxu0 %v934_v18  ;;  %1355 = vmatpush1.xpose.msra.mxu1 %v936_v19  ;;  %v1018_v18 = vld [vmem:[%s3369_s17 + $0x4c0] sm:$0xff]  ;;  %v1020_v19 = vld [vmem:[%s3369_s17 + $0x4d0] sm:$0xff] }
 0x132   : > { %1286 = vmatprep.subr.mxu0 %v919_v21  ;;  %1356 = vmatprep.subr.mxu1 %v921_v22  ;;  %v1003_v21 = vld [vmem:[%s3369_s17 + $0x448] sm:$0xff]  ;;  %v1005_v22 = vld [vmem:[%s3369_s17 + $0x458] sm:$0xff] }
 0x135   : > { %1287 = vmatpush1.xpose.msra.mxu0 %v918_v23  ;;  %1357 = vmatpush1.xpose.msra.mxu1 %v920_v24  ;;  %v1002_v23 = vld [vmem:[%s3369_s17 + $0x440] sm:$0xff]  ;;  %v1004_v24 = vld [vmem:[%s3369_s17 + $0x450] sm:$0xff] }
 0x136   : > { %1288 = vmatprep.subr.mxu0 %v903_v27  ;;  %1358 = vmatprep.subr.mxu1 %v905_v28  ;;  %v987_v27 = vld [vmem:[%s3369_s17 + $0x3c8] sm:$0xff]  ;;  %v989_v28 = vld [vmem:[%s3369_s17 + $0x3d8] sm:$0xff] }
 0x139   : > { %1289 = vmatpush1.xpose.msra.mxu0 %v902_v29  ;;  %1359 = vmatpush1.xpose.msra.mxu1 %v904_v30  ;;  %v986_v29 = vld [vmem:[%s3369_s17 + $0x3c0] sm:$0xff]  ;;  %v988_v30 = vld [vmem:[%s3369_s17 + $0x3d0] sm:$0xff] }
 0x13a   : > { %1290 = vmatprep.subr.mxu0 %v887_v31  ;;  %1360 = vmatprep.subr.mxu1 %v889_v33  ;;  %v971_v31 = vld [vmem:[%s3369_s17 + $0x348] sm:$0xff]  ;;  %v973_v33 = vld [vmem:[%s3369_s17 + $0x358] sm:$0xff] }
 0x13d   : > { %1291 = vmatpush1.xpose.msra.mxu0 %v886_v36  ;;  %1361 = vmatpush1.xpose.msra.mxu1 %v888_v37  ;;  %v970_v36 = vld [vmem:[%s3369_s17 + $0x340] sm:$0xff]  ;;  %v972_v37 = vld [vmem:[%s3369_s17 + $0x350] sm:$0xff] }
 0x13e   : > { %1292 = vmatprep.subr.mxu0 %v871_v38  ;;  %1362 = vmatprep.subr.mxu1 %v873_v39  ;;  %v955_v38 = vld [vmem:[%s3369_s17 + $0x2c8] sm:$0xff]  ;;  %v957_v39 = vld [vmem:[%s3369_s17 + $0x2d8] sm:$0xff] }
 0x141   : > { %1293 = vmatpush1.xpose.msra.mxu0 %v870_v45  ;;  %1363 = vmatpush1.xpose.msra.mxu1 %v872_v46  ;;  %v938_v45 = vld [vmem:[%s3369_s17 + $0x240] sm:$0xff]  ;;  %v940_v46 = vld [vmem:[%s3369_s17 + $0x250] sm:$0xff] }
 0x142   : > { %1402 = vmatprep.subr.mxu0 %v1115_v47  ;;  %1472 = vmatprep.subr.mxu1 %v1117_v48  ;;  %v923_v47 = vld [vmem:[%s3369_s17 + $0x1c8] sm:$0xff]  ;;  %v925_v48 = vld [vmem:[%s3369_s17 + $0x1d8] sm:$0xff] }
 0x144   : > { %1327 = vmatmul.mubr.f32.vlgmr.msra.gmra.mxu0 %v854_v50  ;;  %1397 = vmatmul.mubr.f32.vlgmr.msra.gmra.mxu1 %v856_v51  ;;  %v907_v50 = vld [vmem:[%s3369_s17 + $0x148] sm:$0xff]  ;;  %v909_v51 = vld [vmem:[%s3369_s17 + $0x158] sm:$0xff] }
 0x145   : > { %1403 = vmatpush1.xpose.msra.mxu0 %v1114_v54  ;;  %1473 = vmatpush1.xpose.msra.mxu1 %v1116_v55  ;;  %v891_v54 = vld [vmem:[%s3369_s17 + $0xc8] sm:$0xff]  ;;  %v893_v55 = vld [vmem:[%s3369_s17 + $0xd8] sm:$0xff] }
 0x146   : > { %1404 = vmatprep.subr.mxu0 %v1099_v56  ;;  %1474 = vmatprep.subr.mxu1 %v1101_v25  ;;  %v890_v56 = vld [vmem:[%s3369_s17 + $0xc0] sm:$0xff]  ;;  %v892_v25 = vld [vmem:[%s3369_s17 + $0xd0] sm:$0xff] }
 0x147   : > { %1466 = vmatprep.mubr.f32.mxu0 %v859_v57  ;;  %1536 = vmatprep.mubr.f32.mxu1 %v861_v58  ;;  %v875_v57 = vld [vmem:[%s3369_s17 + $0x48] sm:$0xff]  ;;  %v877_v58 = vld [vmem:[%s3369_s17 + $0x58] sm:$0xff] }
 0x149   : > { %1405 = vmatpush1.xpose.msra.mxu0 %v1098_v26  ;;  %1475 = vmatpush1.xpose.msra.mxu1 %v1100_v59  ;;  %v805_v26 = vrot.slane %v3565_v42, %v772_v6  ;;  %v813_v59 = vrot.slane %v3565_v42, %v780_v7  ;;  %v1121_v6 = vld [vmem:[%s3369_s17 + $0x7f8] sm:$0xff]  ;;  %v833_v7 = vrot.slane %v3565_v42, %v800_v13  ;;  %v1102_v13 = vld [vmem:[%s3369_s17 + $0x760] sm:$0xff] }
 0x14a   : > { %1406 = vmatprep.subr.mxu0 %v1083_v60  ;;  %1476 = vmatprep.subr.mxu1 %v1085_v61  ;;  %v502_v60 = vld [vmem:[%s3355_s25 + $0x40] sm:$0xff]  ;;  %v504_v61 = vld [vmem:[%s3355_s25 + $0x50] sm:$0xff] }
 0x14d   : > { %1407 = vmatpush1.xpose.msra.mxu0 %v1082_v62  ;;  %1477 = vmatpush1.xpose.msra.mxu1 %v1084_v63  ;;  %v874_v62 = vld [vmem:[%s3369_s17 + $0x40] sm:$0xff]  ;;  %v876_v63 = vld [vmem:[%s3369_s17 + $0x50] sm:$0xff] }
 0x14e   : > { %1408 = vmatprep.subr.mxu0 %v1067_v0  ;;  %1478 = vmatprep.subr.mxu1 %v1069_v1  ;;  %v1119_v0 = vld [vmem:[%s3369_s17 + $0x7e8] sm:$0xff]  ;;  %v825_v1 = vrot.slane %v3565_v42, %v792_v12  ;;  %v1105_v12 = vld [vmem:[%s3369_s17 + $0x778] sm:$0xff] }
 0x151   : > { %1409 = vmatpush1.xpose.msra.mxu0 %v1066_v2  ;;  %1479 = vmatpush1.xpose.msra.mxu1 %v1068_v3  ;;  %v858_v2 = vmul.f32 %v805_v26, %v502_v60  ;;  %v860_v3 = vmul.f32 %v813_v59, %v504_v61  ;;  %v942_v26 = vld [vmem:[%s3369_s17 + $0x260] sm:$0xff]  ;;  %v944_v59 = vld [vmem:[%s3369_s17 + $0x270] sm:$0xff]  ;;  %v927_v60 = vld [vmem:[%s3369_s17 + $0x1e8] sm:$0xff] }
 0x152   : > { %1410 = vmatprep.subr.mxu0 %v1051_v4  ;;  %1480 = vmatprep.subr.mxu1 %v1053_v5  ;;  %v507_v4 = vld [vmem:[%s3355_s25 + $0x68] sm:$0xff]  ;;  %v509_v5 = vld [vmem:[%s3355_s25 + $0x78] sm:$0xff] }
 0x153   : > { %v929_v61 = vld [vmem:[%s3369_s17 + $0x1f8] sm:$0xff] }
 0x155   : > { %1411 = vmatpush1.xpose.msra.mxu0 %v1050_v8  ;;  %1481 = vmatpush1.xpose.msra.mxu1 %v1052_v9  ;;  %v1118_v8 = vld [vmem:[%s3369_s17 + $0x7e0] sm:$0xff]  ;;  %v1120_v9 = vld [vmem:[%s3369_s17 + $0x7f0] sm:$0xff] }
 0x156   : > { %1412 = vmatprep.subr.mxu0 %v1035_v10  ;;  %1482 = vmatprep.subr.mxu1 %v1037_v11  ;;  %v1103_v10 = vld [vmem:[%s3369_s17 + $0x768] sm:$0xff]  ;;  %v863_v11 = vmul.f32 %v825_v1, %v507_v4  ;;  %v910_v1 = vld [vmem:[%s3369_s17 + $0x160] sm:$0xff] }
 0x157   : > { %v894_v4 = vld [vmem:[%s3369_s17 + $0xe0] sm:$0xff] }
 0x159   : > { %1413 = vmatpush1.xpose.msra.mxu0 %v1034_v14  ;;  %1483 = vmatpush1.xpose.msra.mxu1 %v1036_v15  ;;  %v865_v14 = vmul.f32 %v833_v7, %v509_v5  ;;  %v1104_v15 = vld [vmem:[%s3369_s17 + $0x770] sm:$0xff] }
 0x15a   : > { %1414 = vmatprep.subr.mxu0 %v1019_v16  ;;  %1484 = vmatprep.subr.mxu1 %v1021_v17  ;;  %v1087_v16 = vld [vmem:[%s3369_s17 + $0x6e8] sm:$0xff]  ;;  %v1089_v17 = vld [vmem:[%s3369_s17 + $0x6f8] sm:$0xff]  ;;  %v912_v7 = vld [vmem:[%s3369_s17 + $0x170] sm:$0xff] }
 0x15b   : > { %v896_v5 = vld [vmem:[%s3369_s17 + $0xf0] sm:$0xff] }
 0x15d   : > { %1415 = vmatpush1.xpose.msra.mxu0 %v1018_v18  ;;  %1485 = vmatpush1.xpose.msra.mxu1 %v1020_v19  ;;  %v1086_v18 = vld [vmem:[%s3369_s17 + $0x6e0] sm:$0xff]  ;;  %v1088_v19 = vld [vmem:[%s3369_s17 + $0x6f0] sm:$0xff] }
 0x15e   : > { %1416 = vmatprep.subr.mxu0 %v1003_v21  ;;  %1486 = vmatprep.subr.mxu1 %v1005_v22  ;;  %v1071_v21 = vld [vmem:[%s3369_s17 + $0x668] sm:$0xff]  ;;  %v1073_v22 = vld [vmem:[%s3369_s17 + $0x678] sm:$0xff] }
 0x161   : > { %1417 = vmatpush1.xpose.msra.mxu0 %v1002_v23  ;;  %1487 = vmatpush1.xpose.msra.mxu1 %v1004_v24  ;;  %v1070_v23 = vld [vmem:[%s3369_s17 + $0x660] sm:$0xff]  ;;  %v1072_v24 = vld [vmem:[%s3369_s17 + $0x670] sm:$0xff] }
 0x162   : > { %1418 = vmatprep.subr.mxu0 %v987_v27  ;;  %1488 = vmatprep.subr.mxu1 %v989_v28  ;;  %v1055_v27 = vld [vmem:[%s3369_s17 + $0x5e8] sm:$0xff]  ;;  %v1057_v28 = vld [vmem:[%s3369_s17 + $0x5f8] sm:$0xff] }
 0x165   : > { %1419 = vmatpush1.xpose.msra.mxu0 %v986_v29  ;;  %1489 = vmatpush1.xpose.msra.mxu1 %v988_v30  ;;  %v1054_v29 = vld [vmem:[%s3369_s17 + $0x5e0] sm:$0xff]  ;;  %v1056_v30 = vld [vmem:[%s3369_s17 + $0x5f0] sm:$0xff] }
 0x166   : > { %1420 = vmatprep.subr.mxu0 %v971_v31  ;;  %1490 = vmatprep.subr.mxu1 %v973_v33  ;;  %v1039_v31 = vld [vmem:[%s3369_s17 + $0x568] sm:$0xff]  ;;  %v1041_v33 = vld [vmem:[%s3369_s17 + $0x578] sm:$0xff] }
 0x169   : > { %1421 = vmatpush1.xpose.msra.mxu0 %v970_v36  ;;  %1491 = vmatpush1.xpose.msra.mxu1 %v972_v37  ;;  %v1038_v36 = vld [vmem:[%s3369_s17 + $0x560] sm:$0xff]  ;;  %v1040_v37 = vld [vmem:[%s3369_s17 + $0x570] sm:$0xff] }
 0x16a   : > { %1422 = vmatprep.subr.mxu0 %v955_v38  ;;  %1492 = vmatprep.subr.mxu1 %v957_v39  ;;  %v1023_v38 = vld [vmem:[%s3369_s17 + $0x4e8] sm:$0xff]  ;;  %v1025_v39 = vld [vmem:[%s3369_s17 + $0x4f8] sm:$0xff] }
 0x16d   : > { %1423 = vmatpush1.xpose.msra.mxu0 %v954_v40  ;;  %1493 = vmatpush1.xpose.msra.mxu1 %v956_v41  ;;  %v1022_v40 = vld [vmem:[%s3369_s17 + $0x4e0] sm:$0xff]  ;;  %v1024_v41 = vld [vmem:[%s3369_s17 + $0x4f0] sm:$0xff] }
 0x16e   : > { %1424 = vmatprep.subr.mxu0 %v939_v43  ;;  %1494 = vmatprep.subr.mxu1 %v941_v44  ;;  %v1007_v43 = vld [vmem:[%s3369_s17 + $0x468] sm:$0xff]  ;;  %v1009_v44 = vld [vmem:[%s3369_s17 + $0x478] sm:$0xff] }
 0x171   : > { %1425 = vmatpush1.xpose.msra.mxu0 %v938_v45  ;;  %1495 = vmatpush1.xpose.msra.mxu1 %v940_v46  ;;  %v1006_v45 = vld [vmem:[%s3369_s17 + $0x460] sm:$0xff]  ;;  %v1008_v46 = vld [vmem:[%s3369_s17 + $0x470] sm:$0xff] }
 0x172   : > { %1426 = vmatprep.subr.mxu0 %v923_v47  ;;  %1496 = vmatprep.subr.mxu1 %v925_v48  ;;  %v991_v47 = vld [vmem:[%s3369_s17 + $0x3e8] sm:$0xff]  ;;  %v993_v48 = vld [vmem:[%s3369_s17 + $0x3f8] sm:$0xff] }
 0x175   : > { %1427 = vmatpush1.xpose.msra.mxu0 %v922_v32  ;;  %1497 = vmatpush1.xpose.msra.mxu1 %v924_v49  ;;  %v990_v32 = vld [vmem:[%s3369_s17 + $0x3e0] sm:$0xff]  ;;  %v992_v49 = vld [vmem:[%s3369_s17 + $0x3f0] sm:$0xff] }
 0x176   : > { %1428 = vmatprep.subr.mxu0 %v907_v50  ;;  %1498 = vmatprep.subr.mxu1 %v909_v51  ;;  %v975_v50 = vld [vmem:[%s3369_s17 + $0x368] sm:$0xff]  ;;  %v977_v51 = vld [vmem:[%s3369_s17 + $0x378] sm:$0xff] }
 0x179   : > { %1429 = vmatpush1.xpose.msra.mxu0 %v906_v52  ;;  %1499 = vmatpush1.xpose.msra.mxu1 %v908_v53  ;;  %v974_v52 = vld [vmem:[%s3369_s17 + $0x360] sm:$0xff]  ;;  %v976_v53 = vld [vmem:[%s3369_s17 + $0x370] sm:$0xff] }
 0x17a   : > { %1430 = vmatprep.subr.mxu0 %v891_v54  ;;  %1500 = vmatprep.subr.mxu1 %v893_v55  ;;  %v959_v54 = vld [vmem:[%s3369_s17 + $0x2e8] sm:$0xff]  ;;  %v961_v55 = vld [vmem:[%s3369_s17 + $0x2f8] sm:$0xff] }
 0x17d   : > { %1431 = vmatpush1.xpose.msra.mxu0 %v890_v56  ;;  %1501 = vmatpush1.xpose.msra.mxu1 %v892_v25  ;;  %v958_v56 = vld [vmem:[%s3369_s17 + $0x2e0] sm:$0xff]  ;;  %v960_v25 = vld [vmem:[%s3369_s17 + $0x2f0] sm:$0xff] }
 0x17e   : > { %1432 = vmatprep.subr.mxu0 %v875_v57  ;;  %1502 = vmatprep.subr.mxu1 %v877_v58  ;;  %v943_v57 = vld [vmem:[%s3369_s17 + $0x268] sm:$0xff]  ;;  %v945_v58 = vld [vmem:[%s3369_s17 + $0x278] sm:$0xff] }
 0x181   : > { %1433 = vmatpush1.xpose.msra.mxu0 %v874_v62  ;;  %1503 = vmatpush1.xpose.msra.mxu1 %v876_v63  ;;  %v926_v62 = vld [vmem:[%s3369_s17 + $0x1e0] sm:$0xff]  ;;  %v928_v63 = vld [vmem:[%s3369_s17 + $0x1f0] sm:$0xff] }
 0x182   : > { %1542 = vmatprep.subr.mxu0 %v1119_v0  ;;  %1612 = vmatprep.subr.mxu1 %v1121_v6  ;;  %v911_v0 = vld [vmem:[%s3369_s17 + $0x168] sm:$0xff]  ;;  %v913_v6 = vld [vmem:[%s3369_s17 + $0x178] sm:$0xff] }
 0x184   : > { %1467 = vmatmul.mubr.f32.vlgmr.msra.gmra.mxu0 %v858_v2  ;;  %1537 = vmatmul.mubr.f32.vlgmr.msra.gmra.mxu1 %v860_v3  ;;  %v895_v2 = vld [vmem:[%s3369_s17 + $0xe8] sm:$0xff]  ;;  %v897_v3 = vld [vmem:[%s3369_s17 + $0xf8] sm:$0xff] }
 0x185   : > { %1543 = vmatpush1.xpose.msra.mxu0 %v1118_v8  ;;  %1613 = vmatpush1.xpose.msra.mxu1 %v1120_v9  ;;  %v879_v8 = vld [vmem:[%s3369_s17 + $0x68] sm:$0xff]  ;;  %v881_v9 = vld [vmem:[%s3369_s17 + $0x78] sm:$0xff] }
 0x186   : > { %1544 = vmatprep.subr.mxu0 %v1103_v10  ;;  %1614 = vmatprep.subr.mxu1 %v1105_v12  ;;  %v821_v10 = vrot.slane %v3565_v42, %v788_v34  ;;  %v829_v12 = vrot.slane %v3565_v42, %v796_v35  ;;  %v752_v35 = vld [vmem:[%s3363_s13 + $0x790] sm:$0xff]  ;;  %v735_v42 = vld [vmem:[%s3363_s13 + $0x708] sm:$0xff] }
 0x187   : > { %1606 = vmatprep.mubr.f32.mxu0 %v863_v11  ;;  %1676 = vmatprep.mubr.f32.mxu1 %v865_v14  ;;  %v506_v11 = vld [vmem:[%s3355_s25 + $0x60] sm:$0xff]  ;;  %v508_v14 = vld [vmem:[%s3355_s25 + $0x70] sm:$0xff] }
 0x188   : > { %v864_v34 = vmul.f32 %v829_v12, %v508_v14  ;;  %v558_v12 = vld [vmem:[%s3363_s13 + $0x180] sm:$0xff]  ;;  %v543_v14 = vld [vmem:[%s3363_s13 + $0x108] sm:$0xff] }
 0x189   : > { %1545 = vmatpush1.xpose.msra.mxu0 %v1102_v13  ;;  %1615 = vmatpush1.xpose.msra.mxu1 %v1104_v15  ;;  %v878_v13 = vld [vmem:[%s3369_s17 + $0x60] sm:$0xff]  ;;  %v880_v15 = vld [vmem:[%s3369_s17 + $0x70] sm:$0xff] }
 0x18a   : > { %1546 = vmatprep.subr.mxu0 %v1087_v16  ;;  %1616 = vmatprep.subr.mxu1 %v1089_v17  ;;  %v751_v16 = vld [vmem:[%s3363_s13 + $0x788] sm:$0xff]  ;;  %v753_v17 = vld [vmem:[%s3363_s13 + $0x798] sm:$0xff] }
 0x18d   : > { %1547 = vmatpush1.xpose.msra.mxu0 %v1086_v18  ;;  %1617 = vmatpush1.xpose.msra.mxu1 %v1088_v19  ;;  %v862_v18 = vmul.f32 %v821_v10, %v506_v11  ;;  %v737_v19 = vld [vmem:[%s3363_s13 + $0x718] sm:$0xff]  ;;  %v560_v11 = vld [vmem:[%s3363_s13 + $0x190] sm:$0xff] }
 0x18e   : > { %1548 = vmatprep.subr.mxu0 %v1071_v21  ;;  %1618 = vmatprep.subr.mxu1 %v1073_v22  ;;  %v561_v10 = vld [vmem:[%s3363_s13 + $0x198] sm:$0xff] }
 0x191   : > { %1549 = vmatpush1.xpose.msra.mxu0 %v1070_v23  ;;  %1619 = vmatpush1.xpose.msra.mxu1 %v1072_v24 }
 0x192   : > { %1550 = vmatprep.subr.mxu0 %v1055_v27  ;;  %1620 = vmatprep.subr.mxu1 %v1057_v28  ;;  %v734_v28 = vld [vmem:[%s3363_s13 + $0x700] sm:$0xff] }
 0x195   : > { %1551 = vmatpush1.xpose.msra.mxu0 %v1054_v29  ;;  %1621 = vmatpush1.xpose.msra.mxu1 %v1056_v30  ;;  %v736_v29 = vld [vmem:[%s3363_s13 + $0x710] sm:$0xff]  ;;  %v719_v30 = vld [vmem:[%s3363_s13 + $0x688] sm:$0xff] }
 0x196   : > { %1552 = vmatprep.subr.mxu0 %v1039_v31  ;;  %1622 = vmatprep.subr.mxu1 %v1041_v33  ;;  %v721_v31 = vld [vmem:[%s3363_s13 + $0x698] sm:$0xff]  ;;  %v2676_v33 = vld [vmem:[%s3355_s25 + $0x8] sm:$0xff] }
 0x199   : > { %1553 = vmatpush1.xpose.msra.mxu0 %v1038_v36  ;;  %1623 = vmatpush1.xpose.msra.mxu1 %v1040_v37  ;;  %v2677_v36 = vld [vmem:[%s3355_s25 + $0x18] sm:$0xff]  ;;  %v718_v37 = vld [vmem:[%s3363_s13 + $0x680] sm:$0xff] }
 0x19a   : > { %1554 = vmatprep.subr.mxu0 %v1023_v38  ;;  %1624 = vmatprep.subr.mxu1 %v1025_v39  ;;  %v720_v38 = vld [vmem:[%s3363_s13 + $0x690] sm:$0xff]  ;;  %v703_v39 = vld [vmem:[%s3363_s13 + $0x608] sm:$0xff] }
 0x19d   : > { %1555 = vmatpush1.xpose.msra.mxu0 %v1022_v40  ;;  %1625 = vmatpush1.xpose.msra.mxu1 %v1024_v41  ;;  %v705_v40 = vld [vmem:[%s3363_s13 + $0x618] sm:$0xff]  ;;  %v702_v41 = vld [vmem:[%s3363_s13 + $0x600] sm:$0xff] }
 0x19e   : > { %1556 = vmatprep.subr.mxu0 %v1007_v43  ;;  %1626 = vmatprep.subr.mxu1 %v1009_v44  ;;  %v704_v43 = vld [vmem:[%s3363_s13 + $0x610] sm:$0xff]  ;;  %v687_v44 = vld [vmem:[%s3363_s13 + $0x588] sm:$0xff] }
 0x1a1   : > { %1557 = vmatpush1.xpose.msra.mxu0 %v1006_v45  ;;  %1627 = vmatpush1.xpose.msra.mxu1 %v1008_v46  ;;  %v689_v45 = vld [vmem:[%s3363_s13 + $0x598] sm:$0xff]  ;;  %v686_v46 = vld [vmem:[%s3363_s13 + $0x580] sm:$0xff] }
 0x1a2   : > { %1558 = vmatprep.subr.mxu0 %v991_v47  ;;  %1628 = vmatprep.subr.mxu1 %v993_v48  ;;  %v688_v47 = vld [vmem:[%s3363_s13 + $0x590] sm:$0xff]  ;;  %v671_v48 = vld [vmem:[%s3363_s13 + $0x508] sm:$0xff] }
 0x1a5   : > { %1559 = vmatpush1.xpose.msra.mxu0 %v990_v32  ;;  %1629 = vmatpush1.xpose.msra.mxu1 %v992_v49  ;;  %v673_v32 = vld [vmem:[%s3363_s13 + $0x518] sm:$0xff]  ;;  %v670_v49 = vld [vmem:[%s3363_s13 + $0x500] sm:$0xff] }
 0x1a6   : > { %1560 = vmatprep.subr.mxu0 %v975_v50  ;;  %1630 = vmatprep.subr.mxu1 %v977_v51  ;;  %v672_v50 = vld [vmem:[%s3363_s13 + $0x510] sm:$0xff]  ;;  %v655_v51 = vld [vmem:[%s3363_s13 + $0x488] sm:$0xff] }
 0x1a9   : > { %1561 = vmatpush1.xpose.msra.mxu0 %v974_v52  ;;  %1631 = vmatpush1.xpose.msra.mxu1 %v976_v53  ;;  %v657_v52 = vld [vmem:[%s3363_s13 + $0x498] sm:$0xff]  ;;  %v654_v53 = vld [vmem:[%s3363_s13 + $0x480] sm:$0xff] }
 0x1aa   : > { %1562 = vmatprep.subr.mxu0 %v959_v54  ;;  %1632 = vmatprep.subr.mxu1 %v961_v55  ;;  %v656_v54 = vld [vmem:[%s3363_s13 + $0x490] sm:$0xff]  ;;  %v639_v55 = vld [vmem:[%s3363_s13 + $0x408] sm:$0xff] }
 0x1ad   : > { %1563 = vmatpush1.xpose.msra.mxu0 %v958_v56  ;;  %1633 = vmatpush1.xpose.msra.mxu1 %v960_v25  ;;  %v641_v56 = vld [vmem:[%s3363_s13 + $0x418] sm:$0xff]  ;;  %v638_v25 = vld [vmem:[%s3363_s13 + $0x400] sm:$0xff] }
 0x1ae   : > { %1564 = vmatprep.subr.mxu0 %v943_v57  ;;  %1634 = vmatprep.subr.mxu1 %v945_v58  ;;  %v640_v57 = vld [vmem:[%s3363_s13 + $0x410] sm:$0xff]  ;;  %v623_v58 = vld [vmem:[%s3363_s13 + $0x388] sm:$0xff] }
 0x1b1   : > { %1565 = vmatpush1.xpose.msra.mxu0 %v942_v26  ;;  %1635 = vmatpush1.xpose.msra.mxu1 %v944_v59  ;;  %v625_v26 = vld [vmem:[%s3363_s13 + $0x398] sm:$0xff]  ;;  %v622_v59 = vld [vmem:[%s3363_s13 + $0x380] sm:$0xff] }
 0x1b2   : > { %1566 = vmatprep.subr.mxu0 %v927_v60  ;;  %1636 = vmatprep.subr.mxu1 %v929_v61  ;;  %v624_v60 = vld [vmem:[%s3363_s13 + $0x390] sm:$0xff]  ;;  %v607_v61 = vld [vmem:[%s3363_s13 + $0x308] sm:$0xff] }
 0x1b5   : > { %1567 = vmatpush1.xpose.msra.mxu0 %v926_v62  ;;  %1637 = vmatpush1.xpose.msra.mxu1 %v928_v63  ;;  %v609_v62 = vld [vmem:[%s3363_s13 + $0x318] sm:$0xff]  ;;  %v606_v63 = vld [vmem:[%s3363_s13 + $0x300] sm:$0xff] }
 0x1b6   : > { %1568 = vmatprep.subr.mxu0 %v911_v0  ;;  %1638 = vmatprep.subr.mxu1 %v913_v6  ;;  %v608_v0 = vld [vmem:[%s3363_s13 + $0x310] sm:$0xff]  ;;  %v591_v6 = vld [vmem:[%s3363_s13 + $0x288] sm:$0xff] }
 0x1b9   : > { %1569 = vmatpush1.xpose.msra.mxu0 %v910_v1  ;;  %1639 = vmatpush1.xpose.msra.mxu1 %v912_v7  ;;  %v593_v1 = vld [vmem:[%s3363_s13 + $0x298] sm:$0xff]  ;;  %v590_v7 = vld [vmem:[%s3363_s13 + $0x280] sm:$0xff] }
 0x1ba   : > { %1570 = vmatprep.subr.mxu0 %v895_v2  ;;  %1640 = vmatprep.subr.mxu1 %v897_v3  ;;  %v592_v2 = vld [vmem:[%s3363_s13 + $0x290] sm:$0xff]  ;;  %v575_v3 = vld [vmem:[%s3363_s13 + $0x208] sm:$0xff] }
 0x1bd   : > { %1571 = vmatpush1.xpose.msra.mxu0 %v894_v4  ;;  %1641 = vmatpush1.xpose.msra.mxu1 %v896_v5  ;;  %v577_v4 = vld [vmem:[%s3363_s13 + $0x218] sm:$0xff]  ;;  %v574_v5 = vld [vmem:[%s3363_s13 + $0x200] sm:$0xff] }
 0x1be   : > { %1572 = vmatprep.subr.mxu0 %v879_v8  ;;  %1642 = vmatprep.subr.mxu1 %v881_v9  ;;  %v576_v8 = vld [vmem:[%s3363_s13 + $0x210] sm:$0xff]  ;;  %v559_v9 = vld [vmem:[%s3363_s13 + $0x188] sm:$0xff] }
 0x1c1   : > { %1573 = vmatpush1.xpose.msra.mxu0 %v878_v13  ;;  %1643 = vmatpush1.xpose.msra.mxu1 %v880_v15  ;;  %v545_v13 = vld [vmem:[%s3363_s13 + $0x118] sm:$0xff]  ;;  %v542_v15 = vld [vmem:[%s3363_s13 + $0x100] sm:$0xff] }
 0x1c2   : > { %1691 = vmatprep.subr.mxu0 %v751_v16  ;;  %1761 = vmatprep.subr.mxu1 %v753_v17  ;;  %v544_v16 = vld [vmem:[%s3363_s13 + $0x110] sm:$0xff]  ;;  %v527_v17 = vld [vmem:[%s3363_s13 + $0x88] sm:$0xff] }
 0x1c4   : > { %v1188_v21 = vpop.f32.mrf.mxu0  ;;  %1607 = vmatmul.mubr.f32.vlgmr.msra.gmra.mxu0 %v862_v18  ;;  %v1258_v22 = vpop.f32.mrf.mxu1  ;;  %1677 = vmatmul.mubr.f32.vlgmr.msra.gmra.mxu1 %v864_v34  ;;  %v529_v18 = vld [vmem:[%s3363_s13 + $0x98] sm:$0xff]  ;;  %v526_v34 = vld [vmem:[%s3363_s13 + $0x80] sm:$0xff] }
 0x1c5   : > { %v3737_v23 = vadd.f32 %v1258_v22, %v1188_v21  ;;  %1692 = vmatpush1.xpose.msra.mxu0 %v750_v20  ;;  %1762 = vmatpush1.xpose.msra.mxu1 %v752_v35  ;;  %v528_v20 = vld [vmem:[%s3363_s13 + $0x90] sm:$0xff]  ;;  %v511_v35 = vld [vmem:[%s3363_s13 + $0x8] sm:$0xff] }
 0x1c6   : > { %v1190_v24 = vpop.f32.mrf.mxu0  ;;  %v1260_v27 = vpop.f32.mrf.mxu1  ;;  %1693 = vmatprep.subr.mxu0 %v735_v42  ;;  %1763 = vmatprep.subr.mxu1 %v737_v19  ;;  %v513_v42 = vld [vmem:[%s3363_s13 + $0x18] sm:$0xff]  ;;  %v510_v19 = vld [vmem:[%s3363_s13] sm:$0xff]  ;;  %v512_v21 = vld [vmem:[%s3363_s13 + $0x10] sm:$0xff] }
 0x1c7   : > { %1755 = vmatprep.mubr.f32.mxu0 %v2676_v33  ;;  %1825 = vmatprep.mubr.f32.mxu1 %v2677_v36  ;;  %v755_v22 = vld [vmem:[%s3363_s13 + $0x7a8] sm:$0xff]  ;;  %v757_v24 = vld [vmem:[%s3363_s13 + $0x7b8] sm:$0xff]  ;;  %v754_v27 = vld [vmem:[%s3363_s13 + $0x7a0] sm:$0xff] }
 0x1c8   : > { %v2678_v33 = vld [vmem:[%s3355_s25] sm:$0xff] }
 0x1c9   : > { %1694 = vmatpush1.xpose.msra.mxu0 %v734_v28  ;;  %1764 = vmatpush1.xpose.msra.mxu1 %v736_v29  ;;  %v756_v28 = vld [vmem:[%s3363_s13 + $0x7b0] sm:$0xff]  ;;  %v739_v29 = vld [vmem:[%s3363_s13 + $0x728] sm:$0xff] }
 0x1ca   : > { %1695 = vmatprep.subr.mxu0 %v719_v30  ;;  %1765 = vmatprep.subr.mxu1 %v721_v31  ;;  %v741_v30 = vld [vmem:[%s3363_s13 + $0x738] sm:$0xff] }
 0x1cd   : > { %1696 = vmatpush1.xpose.msra.mxu0 %v718_v37  ;;  %1766 = vmatpush1.xpose.msra.mxu1 %v720_v38  ;;  %v2679_v37 = vld [vmem:[%s3355_s25 + $0x10] sm:$0xff] }
 0x1ce   : > { %1697 = vmatprep.subr.mxu0 %v703_v39  ;;  %1767 = vmatprep.subr.mxu1 %v705_v40 }
 0x1d1   : > { %1698 = vmatpush1.xpose.msra.mxu0 %v702_v41  ;;  %1768 = vmatpush1.xpose.msra.mxu1 %v704_v43  ;;  %v738_v41 = vld [vmem:[%s3363_s13 + $0x720] sm:$0xff]  ;;  %v740_v43 = vld [vmem:[%s3363_s13 + $0x730] sm:$0xff] }
 0x1d2   : > { %1699 = vmatprep.subr.mxu0 %v687_v44  ;;  %1769 = vmatprep.subr.mxu1 %v689_v45  ;;  %v723_v45 = vld [vmem:[%s3363_s13 + $0x6a8] sm:$0xff] }
 0x1d5   : > { %1700 = vmatpush1.xpose.msra.mxu0 %v686_v46  ;;  %1770 = vmatpush1.xpose.msra.mxu1 %v688_v47  ;;  %v725_v46 = vld [vmem:[%s3363_s13 + $0x6b8] sm:$0xff]  ;;  %v2680_v47 = vld [vmem:[%s3355_s25 + $0x28] sm:$0xff] }
 0x1d6   : > { %1701 = vmatprep.subr.mxu0 %v671_v48  ;;  %1771 = vmatprep.subr.mxu1 %v673_v32  ;;  %v722_v48 = vld [vmem:[%s3363_s13 + $0x6a0] sm:$0xff]  ;;  %v724_v32 = vld [vmem:[%s3363_s13 + $0x6b0] sm:$0xff] }
 0x1d9   : > { %1702 = vmatpush1.xpose.msra.mxu0 %v670_v49  ;;  %1772 = vmatpush1.xpose.msra.mxu1 %v672_v50  ;;  %v707_v49 = vld [vmem:[%s3363_s13 + $0x628] sm:$0xff]  ;;  %v709_v50 = vld [vmem:[%s3363_s13 + $0x638] sm:$0xff] }
 0x1da   : > { %1703 = vmatprep.subr.mxu0 %v655_v51  ;;  %1773 = vmatprep.subr.mxu1 %v657_v52  ;;  %v706_v51 = vld [vmem:[%s3363_s13 + $0x620] sm:$0xff]  ;;  %v708_v52 = vld [vmem:[%s3363_s13 + $0x630] sm:$0xff] }
 0x1dd   : > { %1704 = vmatpush1.xpose.msra.mxu0 %v654_v53  ;;  %1774 = vmatpush1.xpose.msra.mxu1 %v656_v54  ;;  %v691_v53 = vld [vmem:[%s3363_s13 + $0x5a8] sm:$0xff]  ;;  %v693_v54 = vld [vmem:[%s3363_s13 + $0x5b8] sm:$0xff] }
 0x1de   : > { %1705 = vmatprep.subr.mxu0 %v639_v55  ;;  %1775 = vmatprep.subr.mxu1 %v641_v56  ;;  %v690_v55 = vld [vmem:[%s3363_s13 + $0x5a0] sm:$0xff]  ;;  %v692_v56 = vld [vmem:[%s3363_s13 + $0x5b0] sm:$0xff] }
 0x1e1   : > { %1706 = vmatpush1.xpose.msra.mxu0 %v638_v25  ;;  %1776 = vmatpush1.xpose.msra.mxu1 %v640_v57  ;;  %v675_v25 = vld [vmem:[%s3363_s13 + $0x528] sm:$0xff]  ;;  %v677_v57 = vld [vmem:[%s3363_s13 + $0x538] sm:$0xff] }
 0x1e2   : > { %1707 = vmatprep.subr.mxu0 %v623_v58  ;;  %1777 = vmatprep.subr.mxu1 %v625_v26  ;;  %v674_v58 = vld [vmem:[%s3363_s13 + $0x520] sm:$0xff]  ;;  %v676_v26 = vld [vmem:[%s3363_s13 + $0x530] sm:$0xff] }
 0x1e5   : > { %1708 = vmatpush1.xpose.msra.mxu0 %v622_v59  ;;  %1778 = vmatpush1.xpose.msra.mxu1 %v624_v60  ;;  %v659_v59 = vld [vmem:[%s3363_s13 + $0x4a8] sm:$0xff]  ;;  %v661_v60 = vld [vmem:[%s3363_s13 + $0x4b8] sm:$0xff] }
 0x1e6   : > { %1709 = vmatprep.subr.mxu0 %v607_v61  ;;  %1779 = vmatprep.subr.mxu1 %v609_v62  ;;  %v658_v61 = vld [vmem:[%s3363_s13 + $0x4a0] sm:$0xff]  ;;  %v660_v62 = vld [vmem:[%s3363_s13 + $0x4b0] sm:$0xff] }
 0x1e9   : > { %1710 = vmatpush1.xpose.msra.mxu0 %v606_v63  ;;  %1780 = vmatpush1.xpose.msra.mxu1 %v608_v0  ;;  %v643_v63 = vld [vmem:[%s3363_s13 + $0x428] sm:$0xff]  ;;  %v645_v0 = vld [vmem:[%s3363_s13 + $0x438] sm:$0xff] }
 0x1ea   : > { %1711 = vmatprep.subr.mxu0 %v591_v6  ;;  %1781 = vmatprep.subr.mxu1 %v593_v1  ;;  %v642_v6 = vld [vmem:[%s3363_s13 + $0x420] sm:$0xff]  ;;  %v644_v1 = vld [vmem:[%s3363_s13 + $0x430] sm:$0xff] }
 0x1ed   : > { %1712 = vmatpush1.xpose.msra.mxu0 %v590_v7  ;;  %1782 = vmatpush1.xpose.msra.mxu1 %v592_v2  ;;  %v627_v7 = vld [vmem:[%s3363_s13 + $0x3a8] sm:$0xff]  ;;  %v629_v2 = vld [vmem:[%s3363_s13 + $0x3b8] sm:$0xff] }
 0x1ee   : > { %1713 = vmatprep.subr.mxu0 %v575_v3  ;;  %1783 = vmatprep.subr.mxu1 %v577_v4  ;;  %v626_v3 = vld [vmem:[%s3363_s13 + $0x3a0] sm:$0xff]  ;;  %v628_v4 = vld [vmem:[%s3363_s13 + $0x3b0] sm:$0xff] }
 0x1f1   : > { %1714 = vmatpush1.xpose.msra.mxu0 %v574_v5  ;;  %1784 = vmatpush1.xpose.msra.mxu1 %v576_v8  ;;  %v611_v5 = vld [vmem:[%s3363_s13 + $0x328] sm:$0xff]  ;;  %v613_v8 = vld [vmem:[%s3363_s13 + $0x338] sm:$0xff] }
 0x1f2   : > { %1715 = vmatprep.subr.mxu0 %v559_v9  ;;  %1785 = vmatprep.subr.mxu1 %v561_v10  ;;  %v610_v9 = vld [vmem:[%s3363_s13 + $0x320] sm:$0xff]  ;;  %v612_v10 = vld [vmem:[%s3363_s13 + $0x330] sm:$0xff] }
 0x1f5   : > { %1716 = vmatpush1.xpose.msra.mxu0 %v558_v12  ;;  %1786 = vmatpush1.xpose.msra.mxu1 %v560_v11  ;;  %v595_v12 = vld [vmem:[%s3363_s13 + $0x2a8] sm:$0xff]  ;;  %v597_v11 = vld [vmem:[%s3363_s13 + $0x2b8] sm:$0xff] }
 0x1f6   : > { %1717 = vmatprep.subr.mxu0 %v543_v14  ;;  %1787 = vmatprep.subr.mxu1 %v545_v13  ;;  %v594_v14 = vld [vmem:[%s3363_s13 + $0x2a0] sm:$0xff]  ;;  %v596_v13 = vld [vmem:[%s3363_s13 + $0x2b0] sm:$0xff] }
 0x1f9   : > { %1718 = vmatpush1.xpose.msra.mxu0 %v542_v15  ;;  %1788 = vmatpush1.xpose.msra.mxu1 %v544_v16  ;;  %v579_v15 = vld [vmem:[%s3363_s13 + $0x228] sm:$0xff]  ;;  %v581_v16 = vld [vmem:[%s3363_s13 + $0x238] sm:$0xff] }
 0x1fa   : > { %1719 = vmatprep.subr.mxu0 %v527_v17  ;;  %1789 = vmatprep.subr.mxu1 %v529_v18  ;;  %v578_v17 = vld [vmem:[%s3363_s13 + $0x220] sm:$0xff]  ;;  %v580_v18 = vld [vmem:[%s3363_s13 + $0x230] sm:$0xff] }
 0x1fd   : > { %1720 = vmatpush1.xpose.msra.mxu0 %v526_v34  ;;  %1790 = vmatpush1.xpose.msra.mxu1 %v528_v20  ;;  %v563_v34 = vld [vmem:[%s3363_s13 + $0x1a8] sm:$0xff]  ;;  %v565_v20 = vld [vmem:[%s3363_s13 + $0x1b8] sm:$0xff] }
 0x1fe   : > { %1721 = vmatprep.subr.mxu0 %v511_v35  ;;  %1791 = vmatprep.subr.mxu1 %v513_v42  ;;  %v562_v35 = vld [vmem:[%s3363_s13 + $0x1a0] sm:$0xff]  ;;  %v564_v42 = vld [vmem:[%s3363_s13 + $0x1b0] sm:$0xff] }
 0x201   : > { %1722 = vmatpush1.xpose.msra.mxu0 %v510_v19  ;;  %1792 = vmatpush1.xpose.msra.mxu1 %v512_v21  ;;  %v547_v19 = vld [vmem:[%s3363_s13 + $0x128] sm:$0xff]  ;;  %v549_v21 = vld [vmem:[%s3363_s13 + $0x138] sm:$0xff] }
 0x202   : > { %1831 = vmatprep.subr.mxu0 %v755_v22  ;;  %1901 = vmatprep.subr.mxu1 %v757_v24  ;;  %v546_v22 = vld [vmem:[%s3363_s13 + $0x120] sm:$0xff]  ;;  %v548_v24 = vld [vmem:[%s3363_s13 + $0x130] sm:$0xff] }
 0x204   : > { %v1328_v31 = vpop.f32.mrf.mxu0  ;;  %1756 = vmatmul.mubr.f32.vlgmr.msra.gmra.mxu0 %v2678_v33  ;;  %v1398_v36 = vpop.f32.mrf.mxu1  ;;  %1826 = vmatmul.mubr.f32.vlgmr.msra.gmra.mxu1 %v2679_v37  ;;  %v517_v33 = vld [vmem:[%s3363_s13 + $0x38] sm:$0xff]  ;;  %v516_v37 = vld [vmem:[%s3363_s13 + $0x30] sm:$0xff] }
 0x205   : > { %v1329_v38 = vadd.f32 %v1328_v31, %v3737_v23  ;;  %1832 = vmatpush1.xpose.msra.mxu0 %v754_v27  ;;  %1902 = vmatpush1.xpose.msra.mxu1 %v756_v28  ;;  %v2681_v23 = vld [vmem:[%s3355_s25 + $0x38] sm:$0xff]  ;;  %v531_v27 = vld [vmem:[%s3363_s13 + $0xa8] sm:$0xff] }
 0x206   : > { %v1330_v39 = vpop.f32.mrf.mxu0  ;;  %v1400_v40 = vpop.f32.mrf.mxu1  ;;  %1833 = vmatprep.subr.mxu0 %v739_v29  ;;  %1903 = vmatprep.subr.mxu1 %v741_v30  ;;  %v533_v28 = vld [vmem:[%s3363_s13 + $0xb8] sm:$0xff]  ;;  %v530_v29 = vld [vmem:[%s3363_s13 + $0xa0] sm:$0xff]  ;;  %v532_v30 = vld [vmem:[%s3363_s13 + $0xb0] sm:$0xff] }
 0x207   : > { %v3810_v44 = vadd.f32 %v1398_v36, %v1329_v38  ;;  %1895 = vmatprep.mubr.f32.mxu0 %v2680_v47  ;;  %1965 = vmatprep.mubr.f32.mxu1 %v2681_v23  ;;  %v515_v31 = vld [vmem:[%s3363_s13 + $0x28] sm:$0xff]  ;;  %v514_v36 = vld [vmem:[%s3363_s13 + $0x20] sm:$0xff]  ;;  %v761_v39 = vld [vmem:[%s3363_s13 + $0x7d8] sm:$0xff] }
 0x208   : > { %v759_v38 = vld [vmem:[%s3363_s13 + $0x7c8] sm:$0xff]  ;;  %v758_v40 = vld [vmem:[%s3363_s13 + $0x7c0] sm:$0xff] }
 0x209   : > { %1834 = vmatpush1.xpose.msra.mxu0 %v738_v41  ;;  %1904 = vmatpush1.xpose.msra.mxu1 %v740_v43  ;;  %v760_v41 = vld [vmem:[%s3363_s13 + $0x7d0] sm:$0xff]  ;;  %v743_v43 = vld [vmem:[%s3363_s13 + $0x748] sm:$0xff]  ;;  %v2682_v47 = vld [vmem:[%s3355_s25 + $0x20] sm:$0xff] }
 0x20a   : > { %1835 = vmatprep.subr.mxu0 %v723_v45  ;;  %1905 = vmatprep.subr.mxu1 %v725_v46  ;;  %v745_v45 = vld [vmem:[%s3363_s13 + $0x758] sm:$0xff] }
 0x20d   : > { %1836 = vmatpush1.xpose.msra.mxu0 %v722_v48  ;;  %1906 = vmatpush1.xpose.msra.mxu1 %v724_v32  ;;  %v2683_v48 = vld [vmem:[%s3355_s25 + $0x30] sm:$0xff] }
 0x20e   : > { %1837 = vmatprep.subr.mxu0 %v707_v49  ;;  %1907 = vmatprep.subr.mxu1 %v709_v50 }
 0x211   : > { %1838 = vmatpush1.xpose.msra.mxu0 %v706_v51  ;;  %1908 = vmatpush1.xpose.msra.mxu1 %v708_v52  ;;  %v742_v51 = vld [vmem:[%s3363_s13 + $0x740] sm:$0xff]  ;;  %v744_v52 = vld [vmem:[%s3363_s13 + $0x750] sm:$0xff] }
 0x212   : > { %1839 = vmatprep.subr.mxu0 %v691_v53  ;;  %1909 = vmatprep.subr.mxu1 %v693_v54  ;;  %v727_v54 = vld [vmem:[%s3363_s13 + $0x6c8] sm:$0xff] }
 0x215   : > { %1840 = vmatpush1.xpose.msra.mxu0 %v690_v55  ;;  %1910 = vmatpush1.xpose.msra.mxu1 %v692_v56  ;;  %v729_v55 = vld [vmem:[%s3363_s13 + $0x6d8] sm:$0xff]  ;;  %v2684_v56 = vld [vmem:[%s3355_s25 + $0x48] sm:$0xff] }
 0x216   : > { %1841 = vmatprep.subr.mxu0 %v675_v25  ;;  %1911 = vmatprep.subr.mxu1 %v677_v57  ;;  %v726_v25 = vld [vmem:[%s3363_s13 + $0x6c0] sm:$0xff]  ;;  %v728_v57 = vld [vmem:[%s3363_s13 + $0x6d0] sm:$0xff] }
 0x219   : > { %1842 = vmatpush1.xpose.msra.mxu0 %v674_v58  ;;  %1912 = vmatpush1.xpose.msra.mxu1 %v676_v26  ;;  %v711_v58 = vld [vmem:[%s3363_s13 + $0x648] sm:$0xff]  ;;  %v713_v26 = vld [vmem:[%s3363_s13 + $0x658] sm:$0xff] }
 0x21a   : > { %1843 = vmatprep.subr.mxu0 %v659_v59  ;;  %1913 = vmatprep.subr.mxu1 %v661_v60  ;;  %v710_v59 = vld [vmem:[%s3363_s13 + $0x640] sm:$0xff]  ;;  %v712_v60 = vld [vmem:[%s3363_s13 + $0x650] sm:$0xff] }
 0x21d   : > { %1844 = vmatpush1.xpose.msra.mxu0 %v658_v61  ;;  %1914 = vmatpush1.xpose.msra.mxu1 %v660_v62  ;;  %v695_v61 = vld [vmem:[%s3363_s13 + $0x5c8] sm:$0xff]  ;;  %v697_v62 = vld [vmem:[%s3363_s13 + $0x5d8] sm:$0xff] }
 0x21e   : > { %1845 = vmatprep.subr.mxu0 %v643_v63  ;;  %1915 = vmatprep.subr.mxu1 %v645_v0  ;;  %v694_v63 = vld [vmem:[%s3363_s13 + $0x5c0] sm:$0xff]  ;;  %v696_v0 = vld [vmem:[%s3363_s13 + $0x5d0] sm:$0xff] }
 0x221   : > { %1846 = vmatpush1.xpose.msra.mxu0 %v642_v6  ;;  %1916 = vmatpush1.xpose.msra.mxu1 %v644_v1  ;;  %v679_v6 = vld [vmem:[%s3363_s13 + $0x548] sm:$0xff]  ;;  %v681_v1 = vld [vmem:[%s3363_s13 + $0x558] sm:$0xff] }
 0x222   : > { %1847 = vmatprep.subr.mxu0 %v627_v7  ;;  %1917 = vmatprep.subr.mxu1 %v629_v2  ;;  %v678_v7 = vld [vmem:[%s3363_s13 + $0x540] sm:$0xff]  ;;  %v680_v2 = vld [vmem:[%s3363_s13 + $0x550] sm:$0xff] }
 0x225   : > { %1848 = vmatpush1.xpose.msra.mxu0 %v626_v3  ;;  %1918 = vmatpush1.xpose.msra.mxu1 %v628_v4  ;;  %v663_v3 = vld [vmem:[%s3363_s13 + $0x4c8] sm:$0xff]  ;;  %v665_v4 = vld [vmem:[%s3363_s13 + $0x4d8] sm:$0xff] }
 0x226   : > { %1849 = vmatprep.subr.mxu0 %v611_v5  ;;  %1919 = vmatprep.subr.mxu1 %v613_v8  ;;  %v662_v5 = vld [vmem:[%s3363_s13 + $0x4c0] sm:$0xff]  ;;  %v664_v8 = vld [vmem:[%s3363_s13 + $0x4d0] sm:$0xff] }
 0x229   : > { %1850 = vmatpush1.xpose.msra.mxu0 %v610_v9  ;;  %1920 = vmatpush1.xpose.msra.mxu1 %v612_v10  ;;  %v647_v9 = vld [vmem:[%s3363_s13 + $0x448] sm:$0xff]  ;;  %v649_v10 = vld [vmem:[%s3363_s13 + $0x458] sm:$0xff] }
 0x22a   : > { %1851 = vmatprep.subr.mxu0 %v595_v12  ;;  %1921 = vmatprep.subr.mxu1 %v597_v11  ;;  %v646_v12 = vld [vmem:[%s3363_s13 + $0x440] sm:$0xff]  ;;  %v648_v11 = vld [vmem:[%s3363_s13 + $0x450] sm:$0xff] }
 0x22d   : > { %1852 = vmatpush1.xpose.msra.mxu0 %v594_v14  ;;  %1922 = vmatpush1.xpose.msra.mxu1 %v596_v13  ;;  %v631_v14 = vld [vmem:[%s3363_s13 + $0x3c8] sm:$0xff]  ;;  %v633_v13 = vld [vmem:[%s3363_s13 + $0x3d8] sm:$0xff] }
 0x22e   : > { %1853 = vmatprep.subr.mxu0 %v579_v15  ;;  %1923 = vmatprep.subr.mxu1 %v581_v16  ;;  %v630_v15 = vld [vmem:[%s3363_s13 + $0x3c0] sm:$0xff]  ;;  %v632_v16 = vld [vmem:[%s3363_s13 + $0x3d0] sm:$0xff] }
 0x231   : > { %1854 = vmatpush1.xpose.msra.mxu0 %v578_v17  ;;  %1924 = vmatpush1.xpose.msra.mxu1 %v580_v18  ;;  %v615_v17 = vld [vmem:[%s3363_s13 + $0x348] sm:$0xff]  ;;  %v617_v18 = vld [vmem:[%s3363_s13 + $0x358] sm:$0xff] }
 0x232   : > { %1855 = vmatprep.subr.mxu0 %v563_v34  ;;  %1925 = vmatprep.subr.mxu1 %v565_v20  ;;  %v614_v34 = vld [vmem:[%s3363_s13 + $0x340] sm:$0xff]  ;;  %v616_v20 = vld [vmem:[%s3363_s13 + $0x350] sm:$0xff] }
 0x235   : > { %1856 = vmatpush1.xpose.msra.mxu0 %v562_v35  ;;  %1926 = vmatpush1.xpose.msra.mxu1 %v564_v42  ;;  %v599_v35 = vld [vmem:[%s3363_s13 + $0x2c8] sm:$0xff]  ;;  %v601_v42 = vld [vmem:[%s3363_s13 + $0x2d8] sm:$0xff] }
 0x236   : > { %1857 = vmatprep.subr.mxu0 %v547_v19  ;;  %1927 = vmatprep.subr.mxu1 %v549_v21  ;;  %v598_v19 = vld [vmem:[%s3363_s13 + $0x2c0] sm:$0xff]  ;;  %v600_v21 = vld [vmem:[%s3363_s13 + $0x2d0] sm:$0xff] }
 0x239   : > { %1858 = vmatpush1.xpose.msra.mxu0 %v546_v22  ;;  %1928 = vmatpush1.xpose.msra.mxu1 %v548_v24  ;;  %v583_v22 = vld [vmem:[%s3363_s13 + $0x248] sm:$0xff]  ;;  %v585_v24 = vld [vmem:[%s3363_s13 + $0x258] sm:$0xff] }
 0x23a   : > { %1859 = vmatprep.subr.mxu0 %v531_v27  ;;  %1929 = vmatprep.subr.mxu1 %v533_v28  ;;  %v582_v27 = vld [vmem:[%s3363_s13 + $0x240] sm:$0xff]  ;;  %v584_v28 = vld [vmem:[%s3363_s13 + $0x250] sm:$0xff] }
 0x23d   : > { %1860 = vmatpush1.xpose.msra.mxu0 %v530_v29  ;;  %1930 = vmatpush1.xpose.msra.mxu1 %v532_v30  ;;  %v567_v29 = vld [vmem:[%s3363_s13 + $0x1c8] sm:$0xff]  ;;  %v569_v30 = vld [vmem:[%s3363_s13 + $0x1d8] sm:$0xff] }
 0x23e   : > { %1861 = vmatprep.subr.mxu0 %v515_v31  ;;  %1931 = vmatprep.subr.mxu1 %v517_v33  ;;  %v566_v31 = vld [vmem:[%s3363_s13 + $0x1c0] sm:$0xff]  ;;  %v568_v33 = vld [vmem:[%s3363_s13 + $0x1d0] sm:$0xff] }
 0x241   : > { %1862 = vmatpush1.xpose.msra.mxu0 %v514_v36  ;;  %1932 = vmatpush1.xpose.msra.mxu1 %v516_v37  ;;  %v551_v36 = vld [vmem:[%s3363_s13 + $0x148] sm:$0xff]  ;;  %v553_v37 = vld [vmem:[%s3363_s13 + $0x158] sm:$0xff] }
 0x242   : > { %1971 = vmatprep.subr.mxu0 %v759_v38  ;;  %2041 = vmatprep.subr.mxu1 %v761_v39  ;;  %v550_v38 = vld [vmem:[%s3363_s13 + $0x140] sm:$0xff]  ;;  %v552_v39 = vld [vmem:[%s3363_s13 + $0x150] sm:$0xff] }
 0x244   : > { %v1468_v46 = vpop.f32.mrf.mxu0  ;;  %1896 = vmatmul.mubr.f32.vlgmr.msra.gmra.mxu0 %v2682_v47  ;;  %v1538_v23 = vpop.f32.mrf.mxu1  ;;  %1966 = vmatmul.mubr.f32.vlgmr.msra.gmra.mxu1 %v2683_v48  ;;  %v521_v47 = vld [vmem:[%s3363_s13 + $0x58] sm:$0xff]  ;;  %v520_v48 = vld [vmem:[%s3363_s13 + $0x50] sm:$0xff] }
 0x245   : > { %v1469_v32 = vadd.f32 %v1468_v46, %v3810_v44  ;;  %1972 = vmatpush1.xpose.msra.mxu0 %v758_v40  ;;  %2042 = vmatpush1.xpose.msra.mxu1 %v760_v41  ;;  %v2685_v44 = vld [vmem:[%s3355_s25 + $0x58] sm:$0xff]  ;;  %v535_v40 = vld [vmem:[%s3363_s13 + $0xc8] sm:$0xff] }
 0x246   : > { %v1470_v49 = vpop.f32.mrf.mxu0  ;;  %v1540_v50 = vpop.f32.mrf.mxu1  ;;  %1973 = vmatprep.subr.mxu0 %v743_v43  ;;  %2043 = vmatprep.subr.mxu1 %v745_v45  ;;  %v537_v41 = vld [vmem:[%s3363_s13 + $0xd8] sm:$0xff]  ;;  %v534_v43 = vld [vmem:[%s3363_s13 + $0xc0] sm:$0xff]  ;;  %v536_v45 = vld [vmem:[%s3363_s13 + $0xd0] sm:$0xff] }
 0x247   : > { %v3881_v53 = vadd.f32 %v1538_v23, %v1469_v32  ;;  %2035 = vmatprep.mubr.f32.mxu0 %v2684_v56  ;;  %2105 = vmatprep.mubr.f32.mxu1 %v2685_v44  ;;  %v519_v46 = vld [vmem:[%s3363_s13 + $0x48] sm:$0xff]  ;;  %v518_v23 = vld [vmem:[%s3363_s13 + $0x40] sm:$0xff]  ;;  %v765_v49 = vld [vmem:[%s3363_s13 + $0x7f8] sm:$0xff] }
 0x248   : > { %v763_v32 = vld [vmem:[%s3363_s13 + $0x7e8] sm:$0xff]  ;;  %v762_v50 = vld [vmem:[%s3363_s13 + $0x7e0] sm:$0xff] }
 0x249   : > { %1974 = vmatpush1.xpose.msra.mxu0 %v742_v51  ;;  %2044 = vmatpush1.xpose.msra.mxu1 %v744_v52  ;;  %v764_v51 = vld [vmem:[%s3363_s13 + $0x7f0] sm:$0xff]  ;;  %v747_v52 = vld [vmem:[%s3363_s13 + $0x768] sm:$0xff]  ;;  %v2686_v56 = vld [vmem:[%s3355_s25 + $0x40] sm:$0xff] }
 0x24a   : > { %1975 = vmatprep.subr.mxu0 %v727_v54  ;;  %2045 = vmatprep.subr.mxu1 %v729_v55  ;;  %v749_v54 = vld [vmem:[%s3363_s13 + $0x778] sm:$0xff] }
 0x24d   : > { %1976 = vmatpush1.xpose.msra.mxu0 %v726_v25  ;;  %2046 = vmatpush1.xpose.msra.mxu1 %v728_v57  ;;  %v2687_v25 = vld [vmem:[%s3355_s25 + $0x50] sm:$0xff] }
 0x24e   : > { %1977 = vmatprep.subr.mxu0 %v711_v58  ;;  %2047 = vmatprep.subr.mxu1 %v713_v26 }
 0x251   : > { %1978 = vmatpush1.xpose.msra.mxu0 %v710_v59  ;;  %2048 = vmatpush1.xpose.msra.mxu1 %v712_v60  ;;  %v746_v59 = vld [vmem:[%s3363_s13 + $0x760] sm:$0xff]  ;;  %v748_v60 = vld [vmem:[%s3363_s13 + $0x770] sm:$0xff] }
 0x252   : > { %1979 = vmatprep.subr.mxu0 %v695_v61  ;;  %2049 = vmatprep.subr.mxu1 %v697_v62  ;;  %v731_v62 = vld [vmem:[%s3363_s13 + $0x6e8] sm:$0xff] }
 0x255   : > { %1980 = vmatpush1.xpose.msra.mxu0 %v694_v63  ;;  %2050 = vmatpush1.xpose.msra.mxu1 %v696_v0  ;;  %v733_v63 = vld [vmem:[%s3363_s13 + $0x6f8] sm:$0xff]  ;;  %v2688_v0 = vld [vmem:[%s3355_s25 + $0x68] sm:$0xff] }
 0x256   : > { %1981 = vmatprep.subr.mxu0 %v679_v6  ;;  %2051 = vmatprep.subr.mxu1 %v681_v1  ;;  %v730_v6 = vld [vmem:[%s3363_s13 + $0x6e0] sm:$0xff]  ;;  %v732_v1 = vld [vmem:[%s3363_s13 + $0x6f0] sm:$0xff] }
 0x259   : > { %1982 = vmatpush1.xpose.msra.mxu0 %v678_v7  ;;  %2052 = vmatpush1.xpose.msra.mxu1 %v680_v2  ;;  %v715_v7 = vld [vmem:[%s3363_s13 + $0x668] sm:$0xff]  ;;  %v717_v2 = vld [vmem:[%s3363_s13 + $0x678] sm:$0xff] }
 0x25a   : > { %1983 = vmatprep.subr.mxu0 %v663_v3  ;;  %2053 = vmatprep.subr.mxu1 %v665_v4  ;;  %v714_v3 = vld [vmem:[%s3363_s13 + $0x660] sm:$0xff]  ;;  %v716_v4 = vld [vmem:[%s3363_s13 + $0x670] sm:$0xff] }
 0x25d   : > { %1984 = vmatpush1.xpose.msra.mxu0 %v662_v5  ;;  %2054 = vmatpush1.xpose.msra.mxu1 %v664_v8  ;;  %v699_v5 = vld [vmem:[%s3363_s13 + $0x5e8] sm:$0xff]  ;;  %v701_v8 = vld [vmem:[%s3363_s13 + $0x5f8] sm:$0xff] }
 0x25e   : > { %1985 = vmatprep.subr.mxu0 %v647_v9  ;;  %2055 = vmatprep.subr.mxu1 %v649_v10  ;;  %v698_v9 = vld [vmem:[%s3363_s13 + $0x5e0] sm:$0xff]  ;;  %v700_v10 = vld [vmem:[%s3363_s13 + $0x5f0] sm:$0xff] }
 0x261   : > { %1986 = vmatpush1.xpose.msra.mxu0 %v646_v12  ;;  %2056 = vmatpush1.xpose.msra.mxu1 %v648_v11  ;;  %v683_v12 = vld [vmem:[%s3363_s13 + $0x568] sm:$0xff]  ;;  %v685_v11 = vld [vmem:[%s3363_s13 + $0x578] sm:$0xff] }
 0x262   : > { %1987 = vmatprep.subr.mxu0 %v631_v14  ;;  %2057 = vmatprep.subr.mxu1 %v633_v13  ;;  %v682_v14 = vld [vmem:[%s3363_s13 + $0x560] sm:$0xff]  ;;  %v684_v13 = vld [vmem:[%s3363_s13 + $0x570] sm:$0xff] }
 0x265   : > { %1988 = vmatpush1.xpose.msra.mxu0 %v630_v15  ;;  %2058 = vmatpush1.xpose.msra.mxu1 %v632_v16  ;;  %v667_v15 = vld [vmem:[%s3363_s13 + $0x4e8] sm:$0xff]  ;;  %v669_v16 = vld [vmem:[%s3363_s13 + $0x4f8] sm:$0xff] }
 0x266   : > { %1989 = vmatprep.subr.mxu0 %v615_v17  ;;  %2059 = vmatprep.subr.mxu1 %v617_v18  ;;  %v666_v17 = vld [vmem:[%s3363_s13 + $0x4e0] sm:$0xff]  ;;  %v668_v18 = vld [vmem:[%s3363_s13 + $0x4f0] sm:$0xff] }
 0x269   : > { %1990 = vmatpush1.xpose.msra.mxu0 %v614_v34  ;;  %2060 = vmatpush1.xpose.msra.mxu1 %v616_v20  ;;  %v651_v34 = vld [vmem:[%s3363_s13 + $0x468] sm:$0xff]  ;;  %v653_v20 = vld [vmem:[%s3363_s13 + $0x478] sm:$0xff] }
 0x26a   : > { %1991 = vmatprep.subr.mxu0 %v599_v35  ;;  %2061 = vmatprep.subr.mxu1 %v601_v42  ;;  %v650_v35 = vld [vmem:[%s3363_s13 + $0x460] sm:$0xff]  ;;  %v652_v42 = vld [vmem:[%s3363_s13 + $0x470] sm:$0xff] }
 0x26d   : > { %1992 = vmatpush1.xpose.msra.mxu0 %v598_v19  ;;  %2062 = vmatpush1.xpose.msra.mxu1 %v600_v21  ;;  %v635_v19 = vld [vmem:[%s3363_s13 + $0x3e8] sm:$0xff]  ;;  %v637_v21 = vld [vmem:[%s3363_s13 + $0x3f8] sm:$0xff] }
 0x26e   : > { %1993 = vmatprep.subr.mxu0 %v583_v22  ;;  %2063 = vmatprep.subr.mxu1 %v585_v24  ;;  %v634_v22 = vld [vmem:[%s3363_s13 + $0x3e0] sm:$0xff]  ;;  %v636_v24 = vld [vmem:[%s3363_s13 + $0x3f0] sm:$0xff] }
 0x271   : > { %1994 = vmatpush1.xpose.msra.mxu0 %v582_v27  ;;  %2064 = vmatpush1.xpose.msra.mxu1 %v584_v28  ;;  %v619_v27 = vld [vmem:[%s3363_s13 + $0x368] sm:$0xff]  ;;  %v621_v28 = vld [vmem:[%s3363_s13 + $0x378] sm:$0xff] }
 0x272   : > { %1995 = vmatprep.subr.mxu0 %v567_v29  ;;  %2065 = vmatprep.subr.mxu1 %v569_v30  ;;  %v618_v29 = vld [vmem:[%s3363_s13 + $0x360] sm:$0xff]  ;;  %v620_v30 = vld [vmem:[%s3363_s13 + $0x370] sm:$0xff] }
 0x275   : > { %1996 = vmatpush1.xpose.msra.mxu0 %v566_v31  ;;  %2066 = vmatpush1.xpose.msra.mxu1 %v568_v33  ;;  %v603_v31 = vld [vmem:[%s3363_s13 + $0x2e8] sm:$0xff]  ;;  %v605_v33 = vld [vmem:[%s3363_s13 + $0x2f8] sm:$0xff] }
 0x276   : > { %1997 = vmatprep.subr.mxu0 %v551_v36  ;;  %2067 = vmatprep.subr.mxu1 %v553_v37  ;;  %v602_v36 = vld [vmem:[%s3363_s13 + $0x2e0] sm:$0xff]  ;;  %v604_v37 = vld [vmem:[%s3363_s13 + $0x2f0] sm:$0xff] }
 0x279   : > { %1998 = vmatpush1.xpose.msra.mxu0 %v550_v38  ;;  %2068 = vmatpush1.xpose.msra.mxu1 %v552_v39  ;;  %v587_v38 = vld [vmem:[%s3363_s13 + $0x268] sm:$0xff]  ;;  %v589_v39 = vld [vmem:[%s3363_s13 + $0x278] sm:$0xff] }
 0x27a   : > { %1999 = vmatprep.subr.mxu0 %v535_v40  ;;  %2069 = vmatprep.subr.mxu1 %v537_v41  ;;  %v586_v40 = vld [vmem:[%s3363_s13 + $0x260] sm:$0xff]  ;;  %v588_v41 = vld [vmem:[%s3363_s13 + $0x270] sm:$0xff] }
 0x27d   : > { %2000 = vmatpush1.xpose.msra.mxu0 %v534_v43  ;;  %2070 = vmatpush1.xpose.msra.mxu1 %v536_v45  ;;  %v571_v43 = vld [vmem:[%s3363_s13 + $0x1e8] sm:$0xff]  ;;  %v573_v45 = vld [vmem:[%s3363_s13 + $0x1f8] sm:$0xff] }
 0x27e   : > { %2001 = vmatprep.subr.mxu0 %v519_v46  ;;  %2071 = vmatprep.subr.mxu1 %v521_v47  ;;  %v570_v46 = vld [vmem:[%s3363_s13 + $0x1e0] sm:$0xff]  ;;  %v572_v47 = vld [vmem:[%s3363_s13 + $0x1f0] sm:$0xff] }
 0x281   : > { %2002 = vmatpush1.xpose.msra.mxu0 %v518_v23  ;;  %2072 = vmatpush1.xpose.msra.mxu1 %v520_v48  ;;  %v555_v23 = vld [vmem:[%s3363_s13 + $0x168] sm:$0xff]  ;;  %v557_v48 = vld [vmem:[%s3363_s13 + $0x178] sm:$0xff] }
 0x282   : > { %2111 = vmatprep.subr.mxu0 %v763_v32  ;;  %2181 = vmatprep.subr.mxu1 %v765_v49  ;;  %v554_v32 = vld [vmem:[%s3363_s13 + $0x160] sm:$0xff]  ;;  %v556_v49 = vld [vmem:[%s3363_s13 + $0x170] sm:$0xff] }
 0x284   : > { %v1608_v55 = vpop.f32.mrf.mxu0  ;;  %2036 = vmatmul.mubr.f32.vlgmr.msra.gmra.mxu0 %v2686_v56  ;;  %v1678_v44 = vpop.f32.mrf.mxu1  ;;  %2106 = vmatmul.mubr.f32.vlgmr.msra.gmra.mxu1 %v2687_v25  ;;  %v525_v56 = vld [vmem:[%s3363_s13 + $0x78] sm:$0xff]  ;;  %v524_v25 = vld [vmem:[%s3363_s13 + $0x70] sm:$0xff] }
 0x285   : > { %v1609_v57 = vadd.f32 %v1608_v55, %v3881_v53  ;;  %2112 = vmatpush1.xpose.msra.mxu0 %v762_v50  ;;  %2182 = vmatpush1.xpose.msra.mxu1 %v764_v51  ;;  %v2689_v53 = vld [vmem:[%s3355_s25 + $0x78] sm:$0xff]  ;;  %v539_v50 = vld [vmem:[%s3363_s13 + $0xe8] sm:$0xff] }
 0x286   : > { %v1610_v58 = vpop.f32.mrf.mxu0  ;;  %v1680_v26 = vpop.f32.mrf.mxu1  ;;  %2113 = vmatprep.subr.mxu0 %v747_v52  ;;  %2183 = vmatprep.subr.mxu1 %v749_v54  ;;  %v541_v51 = vld [vmem:[%s3363_s13 + $0xf8] sm:$0xff]  ;;  %v538_v52 = vld [vmem:[%s3363_s13 + $0xe0] sm:$0xff]  ;;  %v540_v54 = vld [vmem:[%s3363_s13 + $0xf0] sm:$0xff] }
 0x287   : > { %v3952_v61 = vadd.f32 %v1678_v44, %v1609_v57  ;;  %2175 = vmatprep.mubr.f32.mxu0 %v2688_v0  ;;  %2245 = vmatprep.mubr.f32.mxu1 %v2689_v53  ;;  %v523_v55 = vld [vmem:[%s3363_s13 + $0x68] sm:$0xff]  ;;  %v522_v44 = vld [vmem:[%s3363_s13 + $0x60] sm:$0xff]  ;;  %v2510_v57 = vld [vmem:[%s423_s11] ss:$0 sm:$0xff] }
 0x289   : > { %2114 = vmatpush1.xpose.msra.mxu0 %v746_v59  ;;  %2184 = vmatpush1.xpose.msra.mxu1 %v748_v60  ;;  %v1690_v58 = vmul.f32 %v2510_v57, %v3952_v61  ;;  %v2690_v59 = vld [vmem:[%s3355_s25 + $0x60] sm:$0xff]  ;;  %v2691_v60 = vld [vmem:[%s3355_s25 + $0x70] sm:$0xff] }
 0x28a   : > { %2115 = vmatprep.subr.mxu0 %v731_v62  ;;  %2185 = vmatprep.subr.mxu1 %v733_v63 }
 0x28d   : > { %2116 = vmatpush1.xpose.msra.mxu0 %v730_v6  ;;  %2186 = vmatpush1.xpose.msra.mxu1 %v732_v1 }
 0x28e   : > { %2117 = vmatprep.subr.mxu0 %v715_v7  ;;  %2187 = vmatprep.subr.mxu1 %v717_v2 }
 0x291   : > { %2118 = vmatpush1.xpose.msra.mxu0 %v714_v3  ;;  %2188 = vmatpush1.xpose.msra.mxu1 %v716_v4 }
 0x292   : > { %2119 = vmatprep.subr.mxu0 %v699_v5  ;;  %2189 = vmatprep.subr.mxu1 %v701_v8 }
 0x295   : > { %2120 = vmatpush1.xpose.msra.mxu0 %v698_v9  ;;  %2190 = vmatpush1.xpose.msra.mxu1 %v700_v10 }
 0x296   : > { %2121 = vmatprep.subr.mxu0 %v683_v12  ;;  %2191 = vmatprep.subr.mxu1 %v685_v11 }
 0x299   : > { %2122 = vmatpush1.xpose.msra.mxu0 %v682_v14  ;;  %2192 = vmatpush1.xpose.msra.mxu1 %v684_v13 }
 0x29a   : > { %2123 = vmatprep.subr.mxu0 %v667_v15  ;;  %2193 = vmatprep.subr.mxu1 %v669_v16  ;;  %v1682_v16 = vld [vmem:[#allocation2] sm:$0xff] }
 0x29d   : > { %2124 = vmatpush1.xpose.msra.mxu0 %v666_v17  ;;  %2194 = vmatpush1.xpose.msra.mxu1 %v668_v18 }
 0x29e   : > { %2125 = vmatprep.subr.mxu0 %v651_v34  ;;  %2195 = vmatprep.subr.mxu1 %v653_v20 }
 0x2a1   : > { %2126 = vmatpush1.xpose.msra.mxu0 %v650_v35  ;;  %2196 = vmatpush1.xpose.msra.mxu1 %v652_v42 }
 0x2a2   : > { %2127 = vmatprep.subr.mxu0 %v635_v19  ;;  %2197 = vmatprep.subr.mxu1 %v637_v21 }
 0x2a5   : > { %2128 = vmatpush1.xpose.msra.mxu0 %v634_v22  ;;  %2198 = vmatpush1.xpose.msra.mxu1 %v636_v24 }
 0x2a6   : > { %2129 = vmatprep.subr.mxu0 %v619_v27  ;;  %2199 = vmatprep.subr.mxu1 %v621_v28 }
 0x2a9   : > { %2130 = vmatpush1.xpose.msra.mxu0 %v618_v29  ;;  %2200 = vmatpush1.xpose.msra.mxu1 %v620_v30 }
 0x2aa   : > { %2131 = vmatprep.subr.mxu0 %v603_v31  ;;  %2201 = vmatprep.subr.mxu1 %v605_v33 }
 0x2ad   : > { %2132 = vmatpush1.xpose.msra.mxu0 %v602_v36  ;;  %2202 = vmatpush1.xpose.msra.mxu1 %v604_v37 }
 0x2ae   : > { %2133 = vmatprep.subr.mxu0 %v587_v38  ;;  %2203 = vmatprep.subr.mxu1 %v589_v39 }
 0x2b1   : > { %2134 = vmatpush1.xpose.msra.mxu0 %v586_v40  ;;  %2204 = vmatpush1.xpose.msra.mxu1 %v588_v41 }
 0x2b2   : > { %2135 = vmatprep.subr.mxu0 %v571_v43  ;;  %2205 = vmatprep.subr.mxu1 %v573_v45 }
 0x2b5   : > { %2136 = vmatpush1.xpose.msra.mxu0 %v570_v46  ;;  %2206 = vmatpush1.xpose.msra.mxu1 %v572_v47 }
 0x2b6   : > { %2137 = vmatprep.subr.mxu0 %v555_v23  ;;  %2207 = vmatprep.subr.mxu1 %v557_v48 }
 0x2b9   : > { %2138 = vmatpush1.xpose.msra.mxu0 %v554_v32  ;;  %2208 = vmatpush1.xpose.msra.mxu1 %v556_v49 }
 0x2ba   : > { %2139 = vmatprep.subr.mxu0 %v539_v50  ;;  %2209 = vmatprep.subr.mxu1 %v541_v51 }
 0x2bd   : > { %2140 = vmatpush1.xpose.msra.mxu0 %v538_v52  ;;  %2210 = vmatpush1.xpose.msra.mxu1 %v540_v54 }
 0x2be   : > { %2141 = vmatprep.subr.mxu0 %v523_v55  ;;  %2211 = vmatprep.subr.mxu1 %v525_v56 }
 0x2c1   : > { %2142 = vmatpush1.xpose.msra.mxu0 %v522_v44  ;;  %2212 = vmatpush1.xpose.msra.mxu1 %v524_v25 }
 0x2c4   : > { %v1757_v26 = vpop.f32.mrf.mxu0  ;;  %2176 = vmatmul.mubr.f32.vlgmr.msra.gmra.mxu0 %v2690_v59  ;;  %2246 = vmatmul.mubr.f32.vlgmr.msra.gmra.mxu1 %v2691_v60  ;;  %v1827_v62 = vpop.f32.mrf.mxu1 }
 0x2c5   : > { %v1758_v63 = vadd.f32 %v1757_v26, %v1690_v58 }
 0x2c6   : > { %v1759_v0 = vpop.f32.mrf.mxu0  ;;  %v1829_v53 = vpop.f32.mrf.mxu1 }
 0x2c7   : > { %v1828_v6 = vadd.f32 %v1827_v62, %v1758_v63 }
 0x304   : > { %v1897_v1 = vpop.f32.mrf.mxu0  ;;  %v1967_v7 = vpop.f32.mrf.mxu1 }
 0x305   : > { %v1898_v2 = vadd.f32 %v1897_v1, %v1828_v6 }
 0x306   : > { %v1899_v3 = vpop.f32.mrf.mxu0  ;;  %v1969_v4 = vpop.f32.mrf.mxu1 }
 0x307   : > { %v1968_v5 = vadd.f32 %v1967_v7, %v1898_v2 }
 0x344   : > { %v2037_v8 = vpop.f32.mrf.mxu0  ;;  %v2107_v9 = vpop.f32.mrf.mxu1 }
 0x345   : > { %v2038_v12 = vadd.f32 %v2037_v8, %v1968_v5 }
 0x346   : > { %v2039_v10 = vpop.f32.mrf.mxu0  ;;  %v2109_v61 = vpop.f32.mrf.mxu1 }
 0x347   : > { %v2108_v11 = vadd.f32 %v2107_v9, %v2038_v12 }
 0x384   : > { %v2177_v14 = vpop.f32.mrf.mxu0  ;;  %v2247_v13 = vpop.f32.mrf.mxu1 }
 0x385   : > { %v2178_v15 = vadd.f32 %v2177_v14, %v2108_v11 }
 0x386   : > { %v2179_v17 = vpop.f32.mrf.mxu0  ;;  %v2249_v18 = vpop.f32.mrf.mxu1 }
 0x387   : > { %v2248_v34 = vadd.f32 %v2247_v13, %v2178_v15  ;;  %2256 = sbr.rel (%p2511_p3) target bundleno = 918 (0x396), region = 76 }
 0x389   : > { %v2251_v20 = vadd.f32 %v2248_v34, %v1682_v16 }
 0x38b   : > { %2252 = vst [vmem:[#allocation2] sm:$0xff] %v2251_v20 }
 0x38c   : > { %v2512_v42 = vld [vmem:[%s431_s1] ss:$0 sm:$0xff] }
 0x392   : > { %v2257_v35 = vld [vmem:[#allocation2] sm:$0xff] }
 0x393   : > { %v2265_v19 = vadd.f32 %v2512_v42, %v2257_v35 }
 0x395   : > { %2266 = vst [vmem:[%s3392_s28] sm:$0xff] %v2265_v19 }
 0x396 PF: > { %s4163_s25 = sld [smem:[#allocation26_spill]]  ;;  %s2283_s5 = sshll.u32 %s3392_s28, 4  ;;  %s2284_s5 = int_to_ptr.vmem [resolvable:$true] %s2283_s5 }
 0x397   : > { %s4164_s15 = sld [smem:[#allocation37_spill]]  ;;  %s2268_s13 = scalar_lea.sflag [#allocation5], %s3378_s19 }
 0x398   : > { %s2860_s2 = scalar_lea.vmem %s2284_s5, 128  ;;  %s3032_s17 = smov [#allocation14]  }
 0x399   : > { %p2861_p8 = scmp.ne.s32.totalorder %s2284_s5, %s2860_s2  ;;  %s2864_s3 = sshll.u32 %s3032_s17, 4  ;;  %s2865_s3 = int_to_ptr.vmem [resolvable:$false] %s2864_s3 }
 0x39a   : > { %s2866_s26 = scalar_lea.vmem %s2865_s3, 256  ;;  %p2867_p12 = scmp.lt.s32.totalorder %s2284_s5, %s2865_s3 }
 0x39b   : > { %p2862_p10 = pnand %p2861_p8, %p3316_p5  ;;  %p2868_p9 = scmp.lt.s32.totalorder %s2866_s26, %s2860_s2 }
 0x39c   : > { %s2514_s27 = sshll.u32 %s4163_s25, 7 }
 0x39d   : > { %s2281_s20 = scalar_lea.hbm %s4164_s15, %s2514_s27  ;;  %p2863_p2 = pneg %p2862_p10 }
 0x39e   : > { %p2869_p13 = por %p2868_p9, %p2867_p12 }
 0x3a0   : > { %p2870_p4 = pnand %p2869_p13, %p2863_p2 }
 0x3a2   : > { %2873 = shalt.err (!%p2870_p4)
}
 0x3a3   : > { %s2874_s11 = scalar_lea.hbm %s2281_s20, 128  ;;  %s2878_s1 = scalar_lea.hbm %s4164_s15, 256 }
 0x3a4   : > { %p2875_p1 = scmp.ne.s32.totalorder %s2281_s20, %s2874_s11  ;;  %p2879_p6 = scmp.lt.s32.totalorder %s2281_s20, %s4164_s15 }
 0x3a5   : > { %p2880_p7 = scmp.lt.s32.totalorder %s2878_s1, %s2874_s11 }
 0x3a6   : > { %p2876_p11 = pnand %p2875_p1, %p3316_p5 }
 0x3a7   : > { %p2881_p3 = por %p2880_p7, %p2879_p6 }
 0x3a8   : > { %p2877_p0 = pneg %p2876_p11 }
 0x3aa   : > { %p2882_p8 = pnand %p2881_p3, %p2877_p0 }
 0x3ac   : > { %2885 = shalt.err (!%p2882_p8)
}
 0x3ad   : > { %2533 = dma.vmem_to_hbm [thread:$0]  (%p3316_p5), %s2284_s5, 128, %s2281_s20, %s2268_s13  }
 0x3ae PF: > { %p2559_p10 = scmp.ge.s32.totalorder %s3020_s10, 2  ;;  %s2295_s29 = sand.u32 1, %s2968_s21  }
 0x3af   : > { %p4165_p2 = scmp.ne.s32.totalorder %s4153_s6, 0  ;;  %s2296_s7 = scalar_lea.sflag [#allocation5], %s2295_s29 }
 0x3b1   : > { %p2555_p12 = pnand %p2559_p10, %p4165_p2 }
 0x3b3   : > { %p2556_p9 = pneg %p2555_p12 }
 0x3b5   : > { %2963 = dma.done.wait (%p2556_p9), %s2296_s7, 128  }
 0x3b6   : > { %2965 = vsyncadd (%p2556_p9), %s2296_s7, 4294967168  ;;  %s31_s10 = sadd.s32 1, %s3020_s10   ;;  %s4167_s30 = sld [smem:[#allocation21_spill]] }
 0x3b7   : > { %p4044_p13 = scmp.ge.s32.totalorder %s31_s10, 6   ;;  %s4168_s27 = sld [smem:[#allocation22_spill]] }
 0x3b8   : > { %s4169_s26 = sld [smem:[#allocation32_spill]]  ;;  %s4176_s21 = smov %s2972_s22 }
 0x3b9   : > { %s4170_s12 = sld [smem:[#allocation23_spill]]  ;;  %s4177_s22 = smov %s2976_s23 }
 0x3ba   : > { %s4171_s28 = sld [smem:[#allocation24_spill]]  ;;  %s4178_s23 = smov %s3301_s24 }
 0x3bb   : > { %s4172_s29 = sld [smem:[#allocation29_spill]]  ;;  %s4183_s7 = smov %s3016_s9 }
 0x3bc   : > { %s4173_s6 = sld [smem:[#allocation27_spill]]  ;;  %s4179_s24 = smov %s4167_s30 }
 0x3bd   : > { %s4174_s18 = sld [smem:[#allocation28_spill]]  ;;  %s4180_s25 = smov %s4168_s27 }
 0x3be   : > { %s4182_s30 = smov %s3012_s8 }
 0x3bf   : > { %s4181_s27 = smov %s4170_s12  ;;  %30 = sbr.rel (!%p4044_p13) target bundleno = 22 (0x16), region = 158 }
 0x3c2   : > { %s4184_s8 = smov %s4173_s6 }
 0x3c3   : > { %s4185_s9 = smov %s4174_s18 }
 0x3c4   :  { %2301 = vsyncpa [#allocation4], 1 }
 0x3c5   :  { %2303 = vsyncpa [#allocation4 + $0x1], 1 }
 0x3c6   :  { %2304 = vsyncpa [#allocation7], 1 }
 0x3c7   :  { %2306 = vsyncpa [#allocation7 + $0x1], 1 }
 0x3c8   :  { %2307 = vsyncpa [#allocation10], 1 }
 0x3c9   :  { %2309 = vsyncpa [#allocation10 + $0x1], 1 }
 0x3ca   :  { %2310 = vsyncpa [#allocation13], 1 }
 0x3cb   :  { %2312 = vsyncpa [#allocation13 + $0x1], 1 }
 0x3cc   :  { %2313 = vsyncpa [#allocation5], 1 }
 0x3cd   :  { %2315 = vsyncpa [#allocation5 + $0x1], 1 }

</bundles_post_ra>
